<compile_context>
chip_gen: v5e
topology: v5e:2x2
jax: 0.10.0
libtpu: 0.0.40
codegen_flags: <defaults>
</compile_context>

<pallas_src>
import functools

import jax
import jax.numpy as jnp
from jax.experimental import pallas as pl
from jax.experimental.pallas import tpu as pltpu

PAD = 4                                 # max dilation -> uniform spatial pre-pad
DILATIONS = (1, 2, 4)
# Distinct depthwise column offsets (kw-1)*d for kw in {0,1,2}, d in DILATIONS.
OFF_COLS = (-4, -2, -1, 0, 1, 2, 4)
OFF_IDX = {o: i for i, o in enumerate(OFF_COLS)}
EPS = 1e-5


@functools.lru_cache(maxsize=None)
def _two_tensorcores() -> bool:
    """Best-effort check: does this chip expose 2 TensorCores (megacore/v7x)?"""
    try:
        kind = jax.devices()[0].device_kind.lower()
    except Exception:
        return False
    return any(tag in kind for tag in ("v7", "v4", "v5p"))


def dpblock3_kernel(x_ref, dw_ref, wpw_ref, bpw_ref, wout_ref, b3_ref, out_ref,
                    *, H):
    """One batch-block per grid step; everything resident in VMEM.

    x_ref    : (NB, 7, H+2P, W*C) pre-shifted lane-aligned input slabs (f32),
                                  one slab per distinct depthwise column offset
    dw_ref   : (27, W*C)          BN1-folded depthwise weights, tiled over W (f32)
                                  (row = dilation_idx*9 + kh*3 + kw)
    wpw_ref  : (3, W*C, W*C)      per-branch kron(I_W, pw_d * s2_d)       (bf16)
    bpw_ref  : (3, W*C)           folded pointwise-path bias b1@pw_f + b2 (f32)
    wout_ref : (3, W*C, W*C)      per-branch kron(I_W, wout_d * s3)       (bf16)
    b3_ref   : (1, W*C)           conv_out BN bias                        (f32)
    out_ref  : (NB, H, W*C)       f32
    """
    NB, _, WC = out_ref.shape
    M = NB * H                          # batch flattened into the matmul M dim

    xs = x_ref[...]                     # (NB, 7, Hp, WC) — all slabs in VMEM
    dw = dw_ref[...]                    # (27, WC)

    o_acc = None
    for di, d in enumerate(DILATIONS):
        # ---- depthwise dilated 3x3 conv (BN1 scale pre-folded into dw).
        #      Every tap is lane-aligned: only the sublane (h) axis is sliced.
        acc = None
        for kh in range(3):
            h0 = PAD + (kh - 1) * d
            for kw in range(3):
                si = OFF_IDX[(kw - 1) * d]
                tap = xs[:, si, h0:h0 + H, :] * dw[di * 9 + kh * 3 + kw]
                acc = tap if acc is None else acc + tap     # (NB, H, WC) f32
        feat = acc.reshape(M, WC).astype(jnp.bfloat16)

        # ---- per-branch pointwise 1x1 conv + BN + ReLU: one (M,WC)x(WC,WC)
        #      bf16 MXU matmul with f32 accumulation ----
        z = jnp.dot(feat, wpw_ref[di], preferred_element_type=jnp.float32)
        z = jnp.maximum(z + bpw_ref[di:di + 1, :], 0.0).astype(jnp.bfloat16)

        # ---- this branch's slice of the conv_out 1x1 (3C -> C); the channel
        #      concat becomes a sum of per-branch matmuls ----
        contrib = jnp.dot(z, wout_ref[di], preferred_element_type=jnp.float32)
        o_acc = contrib if o_acc is None else o_acc + contrib

    o = jnp.maximum(o_acc + b3_ref[...], 0.0)               # (M, WC) f32
    out_ref[...] = o.reshape(NB, H, WC)                     # lane-dense store


def prepare_params(dw_all, sb_all, pw_all, wout, sb3, W):
    """One-time fold of all BatchNorm scales/biases into the conv weights plus
    kron-expansion over the lane-flattened (w, c) axis.  Run ONCE at init, not
    per forward call."""
    C = dw_all.shape[-1]
    WC = W * C
    s1, b1 = sb_all[:, 0], sb_all[:, 1]          # SeparableConv2d.bn
    s2, b2 = sb_all[:, 2], sb_all[:, 3]          # outer per-branch BN
    s3, b3 = sb3[0], sb3[1]                      # conv_out BN

    # BN1 scale folded into the depthwise weights, tiled over W (w-major, c-minor).
    dw_f = dw_all * s1[:, None, None, :]                             # (3,3,3,C)
    dw27 = jnp.tile(dw_f, (1, 1, 1, W)).reshape(27, WC)              # (27, WC)

    # BN2 scale into the pointwise weights; BN1 bias folded *through* pointwise.
    pw_f = pw_all * s2[:, None, :]                                   # (3,C,C)
    bias_pw = jnp.einsum("dc,dce->de", b1, pw_f) + b2                # (3,C)
    wout_f = wout * s3[None, :]                                      # (3C,C)

    # kron-expand the 1x1 convs over the lane-flattened (w, c) axis — kept as a
    # per-branch (3, WC, WC) stack (no zero-padded block-diagonal).
    eyeW = jnp.eye(W, dtype=jnp.float32)
    wpw = jnp.stack([jnp.kron(eyeW, pw_f[d]) for d in range(3)])          # (3,WC,WC)
    wout3 = jnp.stack([jnp.kron(eyeW, wout_f[d * C:(d + 1) * C, :])
                       for d in range(3)])                                # (3,WC,WC)
    bpw = jnp.stack([jnp.tile(bias_pw[d], W) for d in range(3)])          # (3,WC)
    b3t = jnp.tile(b3, W).reshape(1, WC)                                  # (1,WC)

    # bf16 MXU weight operands (activations are cast in-kernel).
    return (dw27.astype(jnp.float32), wpw.astype(jnp.bfloat16),
            bpw.astype(jnp.float32), wout3.astype(jnp.bfloat16),
            b3t.astype(jnp.float32))


@jax.jit
def dpblock3_forward(x_nchw, dw27, wpw, bpw, wout3, b3t):
    # NCHW -> NHWC (module interface is NCHW).
    x = jnp.transpose(x_nchw, (0, 2, 3, 1)).astype(jnp.float32)
    N, H, W, C = x.shape
    WC = W * C
    Hp = H + 2 * PAD

    xpad = jnp.pad(x, ((0, 0), (PAD, PAD), (PAD, PAD), (0, 0)))
    # Pre-shifted lane-aligned slabs: one (Hp, W*C) slab per distinct depthwise
    # column offset so the kernel never slices at a non-128-multiple lane offset.
    slabs = jnp.stack(
        [xpad[:, :, PAD + off:PAD + off + W, :].reshape(N, Hp, WC)
         for off in OFF_COLS], axis=1)                        # (N, 7, Hp, WC)

    # Batch blocking: exactly two "parallel" grid steps on 2-TC chips (each TC
    # takes half the batch); one step with the whole batch flattened into the
    # matmul M dimension on single-TC chips (v5e / v6e).
    if _two_tensorcores() and N >= 2 and N % 2 == 0:
        nb = N // 2
    else:
        nb = N
    grid_n = N // nb

    out2 = pl.pallas_call(
        functools.partial(dpblock3_kernel, H=H),
        out_shape=jax.ShapeDtypeStruct((N, H, WC), jnp.float32),
        grid_spec=pltpu.PrefetchScalarGridSpec(
            num_scalar_prefetch=0,
            grid=(grid_n,),
            in_specs=[
                pl.BlockSpec((nb, 7, Hp, WC), lambda n: (n, 0, 0, 0)),
                # Constant-index weight blocks: fetched once by the pipeline
                # (block index never changes); double-buffer VMEM cost is
                # negligible at this shape, so no Buffered(1) constraint.
                pl.BlockSpec((27, WC), lambda n: (0, 0)),
                pl.BlockSpec((3, WC, WC), lambda n: (0, 0, 0)),
                pl.BlockSpec((3, WC), lambda n: (0, 0)),
                pl.BlockSpec((3, WC, WC), lambda n: (0, 0, 0)),
                pl.BlockSpec((1, WC), lambda n: (0, 0)),
            ],
            out_specs=pl.BlockSpec((nb, H, WC), lambda n: (n, 0, 0)),
        ),
        compiler_params=pltpu.CompilerParams(
            dimension_semantics=("parallel",)),
    )(slabs, dw27, wpw, bpw, wout3, b3t)

    out = out2.reshape(N, H, W, C)
    return jnp.transpose(out, (0, 3, 1, 2))                   # back to NCHW


# ---------------- pure-JAX reference (for correctness check) ----------------
def dpblock3_reference(x_nchw, dw_all, sb_all, pw_all, wout, sb3):
    x = jnp.transpose(x_nchw, (0, 2, 3, 1)).astype(jnp.float32)
    N, H, W, C = x.shape
    dn = jax.lax.conv_dimension_numbers(x.shape, (3, 3, 1, C),
                                        ("NHWC", "HWIO", "NHWC"))
    branches = []
    for di, d in enumerate(DILATIONS):
        w = dw_all[di].reshape(3, 3, 1, C)
        y = jax.lax.conv_general_dilated(
            x, w, window_strides=(1, 1), padding=((d, d), (d, d)),
            rhs_dilation=(d, d), dimension_numbers=dn, feature_group_count=C)
        y = y * sb_all[di, 0] + sb_all[di, 1]
        y = jnp.einsum("nhwc,cd->nhwd", y, pw_all[di])
        y = jnp.maximum(y * sb_all[di, 2] + sb_all[di, 3], 0.0)
        branches.append(y)
    feat = jnp.concatenate(branches, axis=-1)
    o = jnp.einsum("nhwc,cd->nhwd", feat, wout)
    o = jnp.maximum(o * sb3[0] + sb3[1], 0.0)
    return jnp.transpose(o, (0, 3, 1, 2))


# ---------------- deterministic parameter construction ----------------
def make_params(width):
    C = width
    key = jax.random.PRNGKey(0)
    k = jax.random.split(key, 8)

    def kaiming_uniform(kk, shape, fan_in):
        bound = (6.0 / fan_in) ** 0.5
        return jax.random.uniform(kk, shape, jnp.float32, -bound, bound)

    # depthwise 3x3 (fan_in = 9), pointwise 1x1 (fan_in = C), conv_out (fan_in = 3C)
    dw_all = kaiming_uniform(k[0], (3, 3, 3, C), 9)
    pw_all = kaiming_uniform(k[1], (3, C, C), C)          # (cin, cout) layout
    wout = kaiming_uniform(k[2], (3 * C, C), 3 * C)       # (cin, cout) layout

    def bn_fold(kk, n):
        gamma = 1.0 + 0.02 * jax.random.normal(kk, (n, C), jnp.float32)
        beta = jnp.zeros((n, C), jnp.float32)
        rmean = jnp.zeros((n, C), jnp.float32)
        rvar = jnp.ones((n, C), jnp.float32)
        scale = gamma / jnp.sqrt(rvar + EPS)
        bias = beta - rmean * scale
        return scale, bias

    s1, b1 = bn_fold(k[3], 3)    # SeparableConv2d.bn for each dilation branch
    s2, b2 = bn_fold(k[4], 3)    # outer nn.BatchNorm2d for each branch
    s3, b3 = bn_fold(k[5], 1)    # conv_out BatchNorm
    sb_all = jnp.stack([s1, b1, s2, b2], axis=1)          # (3, 4, C)
    sb3 = jnp.concatenate([s3, b3], axis=0)               # (2, C)
    return dw_all, sb_all, pw_all, wout, sb3


if __name__ == "__main__":
    N, C, H, W = 2, 8, 16, 16          # width = 8  ->  W*C = 128 (lane-dense)
    raw_params = make_params(C)
    x = jax.random.normal(jax.random.PRNGKey(1), (N, C, H, W), jnp.float32)

    # One-time parameter folding (hoisted out of the per-call jit).
    folded = prepare_params(*raw_params, W)
    folded = jax.block_until_ready(folded)

    out = dpblock3_forward(x, *folded)
    out = jax.block_until_ready(out)

    ref = jax.block_until_ready(dpblock3_reference(x, *raw_params))

    assert out.shape == (N, C, H, W)
    err = jnp.abs(out - ref)
    # bf16 MXU operands -> tolerance loosened vs. the f32 reference; real
    # indexing / BN-fold bugs produce O(1) errors and are still caught.
    if not (float(err.max()) < 1e-1 and float(err.mean()) < 1.5e-2):
        raise AssertionError(
            "Pallas output mismatch: max=%.4g mean=%.4g"
            % (float(err.max()), float(err.mean())))
    print("KERNEL_OK")
</pallas_src>

<mosaic_0001>
module attributes {stable_mosaic.version = 11 : i64} {
  func.func @dpblock3_kernel(%arg0: i32, %arg1: memref<2x7x24x128xf32, #tpu.memory_space<vmem>>, %arg2: memref<27x128xf32, #tpu.memory_space<vmem>>, %arg3: memref<3x128x128xbf16, #tpu.memory_space<vmem>>, %arg4: memref<3x128xf32, #tpu.memory_space<vmem>>, %arg5: memref<3x128x128xbf16, #tpu.memory_space<vmem>>, %arg6: memref<1x128xf32, #tpu.memory_space<vmem>>, %arg7: memref<2x16x128xf32, #tpu.memory_space<vmem>>) attributes {dimension_semantics = [#tpu.dimension_semantics<parallel>], iteration_bounds = array<i64: 1>, scalar_prefetch = 0 : i64, scratch_operands = 0 : i64, tpu.core_type = #tpu.core_type<tc>, window_params = [{transform_indices = @transform_0, window_bounds = array<i64: 2, 7, 24, 128>}, {pipeline_mode = #tpu.pipeline_mode<synchronous>, transform_indices = @transform_1, window_bounds = array<i64: 27, 128>}, {pipeline_mode = #tpu.pipeline_mode<synchronous>, transform_indices = @transform_2, window_bounds = array<i64: 3, 128, 128>}, {pipeline_mode = #tpu.pipeline_mode<synchronous>, transform_indices = @transform_3, window_bounds = array<i64: 3, 128>}, {pipeline_mode = #tpu.pipeline_mode<synchronous>, transform_indices = @transform_4, window_bounds = array<i64: 3, 128, 128>}, {pipeline_mode = #tpu.pipeline_mode<synchronous>, transform_indices = @transform_5, window_bounds = array<i64: 1, 128>}, {transform_indices = @transform_6, window_bounds = array<i64: 2, 16, 128>}]} {
    %c0 = arith.constant 0 : index
    %c0_0 = arith.constant 0 : index
    %c0_1 = arith.constant 0 : index
    %c0_2 = arith.constant 0 : index
    %0 = vector.load %arg1[%c0, %c0_0, %c0_1, %c0_2] : memref<2x7x24x128xf32, #tpu.memory_space<vmem>>, vector<2x7x24x128xf32>
    %c0_3 = arith.constant 0 : index
    %c0_4 = arith.constant 0 : index
    %1 = vector.load %arg2[%c0_3, %c0_4] : memref<27x128xf32, #tpu.memory_space<vmem>>, vector<27x128xf32>
    %2 = vector.extract_strided_slice %0 {offsets = [0, 2, 3, 0], sizes = [2, 1, 16, 128], strides = [1, 1, 1, 1]} : vector<2x7x24x128xf32> to vector<2x1x16x128xf32>
    %3 = vector.shape_cast %2 : vector<2x1x16x128xf32> to vector<2x16x128xf32>
    %4 = vector.extract_strided_slice %1 {offsets = [0, 0], sizes = [1, 128], strides = [1, 1]} : vector<27x128xf32> to vector<1x128xf32>
    %5 = vector.shape_cast %4 : vector<1x128xf32> to vector<128xf32>
    %6 = vector.shape_cast %5 : vector<128xf32> to vector<1x1x128xf32>
    %7 = vector.broadcast %6 : vector<1x1x128xf32> to vector<2x16x128xf32>
    %8 = arith.mulf %3, %7 : vector<2x16x128xf32>
    %9 = vector.extract_strided_slice %0 {offsets = [0, 3, 3, 0], sizes = [2, 1, 16, 128], strides = [1, 1, 1, 1]} : vector<2x7x24x128xf32> to vector<2x1x16x128xf32>
    %10 = vector.shape_cast %9 : vector<2x1x16x128xf32> to vector<2x16x128xf32>
    %11 = vector.extract_strided_slice %1 {offsets = [1, 0], sizes = [1, 128], strides = [1, 1]} : vector<27x128xf32> to vector<1x128xf32>
    %12 = vector.shape_cast %11 : vector<1x128xf32> to vector<128xf32>
    %13 = vector.shape_cast %12 : vector<128xf32> to vector<1x1x128xf32>
    %14 = vector.broadcast %13 : vector<1x1x128xf32> to vector<2x16x128xf32>
    %15 = arith.mulf %10, %14 : vector<2x16x128xf32>
    %16 = arith.addf %8, %15 : vector<2x16x128xf32>
    %17 = vector.extract_strided_slice %0 {offsets = [0, 4, 3, 0], sizes = [2, 1, 16, 128], strides = [1, 1, 1, 1]} : vector<2x7x24x128xf32> to vector<2x1x16x128xf32>
    %18 = vector.shape_cast %17 : vector<2x1x16x128xf32> to vector<2x16x128xf32>
    %19 = vector.extract_strided_slice %1 {offsets = [2, 0], sizes = [1, 128], strides = [1, 1]} : vector<27x128xf32> to vector<1x128xf32>
    %20 = vector.shape_cast %19 : vector<1x128xf32> to vector<128xf32>
    %21 = vector.shape_cast %20 : vector<128xf32> to vector<1x1x128xf32>
    %22 = vector.broadcast %21 : vector<1x1x128xf32> to vector<2x16x128xf32>
    %23 = arith.mulf %18, %22 : vector<2x16x128xf32>
    %24 = arith.addf %16, %23 : vector<2x16x128xf32>
    %25 = vector.extract_strided_slice %0 {offsets = [0, 2, 4, 0], sizes = [2, 1, 16, 128], strides = [1, 1, 1, 1]} : vector<2x7x24x128xf32> to vector<2x1x16x128xf32>
    %26 = vector.shape_cast %25 : vector<2x1x16x128xf32> to vector<2x16x128xf32>
    %27 = vector.extract_strided_slice %1 {offsets = [3, 0], sizes = [1, 128], strides = [1, 1]} : vector<27x128xf32> to vector<1x128xf32>
    %28 = vector.shape_cast %27 : vector<1x128xf32> to vector<128xf32>
    %29 = vector.shape_cast %28 : vector<128xf32> to vector<1x1x128xf32>
    %30 = vector.broadcast %29 : vector<1x1x128xf32> to vector<2x16x128xf32>
    %31 = arith.mulf %26, %30 : vector<2x16x128xf32>
    %32 = arith.addf %24, %31 : vector<2x16x128xf32>
    %33 = vector.extract_strided_slice %0 {offsets = [0, 3, 4, 0], sizes = [2, 1, 16, 128], strides = [1, 1, 1, 1]} : vector<2x7x24x128xf32> to vector<2x1x16x128xf32>
    %34 = vector.shape_cast %33 : vector<2x1x16x128xf32> to vector<2x16x128xf32>
    %35 = vector.extract_strided_slice %1 {offsets = [4, 0], sizes = [1, 128], strides = [1, 1]} : vector<27x128xf32> to vector<1x128xf32>
    %36 = vector.shape_cast %35 : vector<1x128xf32> to vector<128xf32>
    %37 = vector.shape_cast %36 : vector<128xf32> to vector<1x1x128xf32>
    %38 = vector.broadcast %37 : vector<1x1x128xf32> to vector<2x16x128xf32>
    %39 = arith.mulf %34, %38 : vector<2x16x128xf32>
    %40 = arith.addf %32, %39 : vector<2x16x128xf32>
    %41 = vector.extract_strided_slice %0 {offsets = [0, 4, 4, 0], sizes = [2, 1, 16, 128], strides = [1, 1, 1, 1]} : vector<2x7x24x128xf32> to vector<2x1x16x128xf32>
    %42 = vector.shape_cast %41 : vector<2x1x16x128xf32> to vector<2x16x128xf32>
    %43 = vector.extract_strided_slice %1 {offsets = [5, 0], sizes = [1, 128], strides = [1, 1]} : vector<27x128xf32> to vector<1x128xf32>
    %44 = vector.shape_cast %43 : vector<1x128xf32> to vector<128xf32>
    %45 = vector.shape_cast %44 : vector<128xf32> to vector<1x1x128xf32>
    %46 = vector.broadcast %45 : vector<1x1x128xf32> to vector<2x16x128xf32>
    %47 = arith.mulf %42, %46 : vector<2x16x128xf32>
    %48 = arith.addf %40, %47 : vector<2x16x128xf32>
    %49 = vector.extract_strided_slice %0 {offsets = [0, 2, 5, 0], sizes = [2, 1, 16, 128], strides = [1, 1, 1, 1]} : vector<2x7x24x128xf32> to vector<2x1x16x128xf32>
    %50 = vector.shape_cast %49 : vector<2x1x16x128xf32> to vector<2x16x128xf32>
    %51 = vector.extract_strided_slice %1 {offsets = [6, 0], sizes = [1, 128], strides = [1, 1]} : vector<27x128xf32> to vector<1x128xf32>
    %52 = vector.shape_cast %51 : vector<1x128xf32> to vector<128xf32>
    %53 = vector.shape_cast %52 : vector<128xf32> to vector<1x1x128xf32>
    %54 = vector.broadcast %53 : vector<1x1x128xf32> to vector<2x16x128xf32>
    %55 = arith.mulf %50, %54 : vector<2x16x128xf32>
    %56 = arith.addf %48, %55 : vector<2x16x128xf32>
    %57 = vector.extract_strided_slice %0 {offsets = [0, 3, 5, 0], sizes = [2, 1, 16, 128], strides = [1, 1, 1, 1]} : vector<2x7x24x128xf32> to vector<2x1x16x128xf32>
    %58 = vector.shape_cast %57 : vector<2x1x16x128xf32> to vector<2x16x128xf32>
    %59 = vector.extract_strided_slice %1 {offsets = [7, 0], sizes = [1, 128], strides = [1, 1]} : vector<27x128xf32> to vector<1x128xf32>
    %60 = vector.shape_cast %59 : vector<1x128xf32> to vector<128xf32>
    %61 = vector.shape_cast %60 : vector<128xf32> to vector<1x1x128xf32>
    %62 = vector.broadcast %61 : vector<1x1x128xf32> to vector<2x16x128xf32>
    %63 = arith.mulf %58, %62 : vector<2x16x128xf32>
    %64 = arith.addf %56, %63 : vector<2x16x128xf32>
    %65 = vector.extract_strided_slice %0 {offsets = [0, 4, 5, 0], sizes = [2, 1, 16, 128], strides = [1, 1, 1, 1]} : vector<2x7x24x128xf32> to vector<2x1x16x128xf32>
    %66 = vector.shape_cast %65 : vector<2x1x16x128xf32> to vector<2x16x128xf32>
    %67 = vector.extract_strided_slice %1 {offsets = [8, 0], sizes = [1, 128], strides = [1, 1]} : vector<27x128xf32> to vector<1x128xf32>
    %68 = vector.shape_cast %67 : vector<1x128xf32> to vector<128xf32>
    %69 = vector.shape_cast %68 : vector<128xf32> to vector<1x1x128xf32>
    %70 = vector.broadcast %69 : vector<1x1x128xf32> to vector<2x16x128xf32>
    %71 = arith.mulf %66, %70 : vector<2x16x128xf32>
    %72 = arith.addf %64, %71 : vector<2x16x128xf32>
    %73 = vector.shape_cast %72 : vector<2x16x128xf32> to vector<32x128xf32>
    %74 = arith.truncf %73 : vector<32x128xf32> to vector<32x128xbf16>
    %c0_5 = arith.constant 0 : index
    %c0_6 = arith.constant 0 : index
    %c0_7 = arith.constant 0 : index
    %75 = vector.load %arg3[%c0_5, %c0_6, %c0_7] : memref<3x128x128xbf16, #tpu.memory_space<vmem>>, vector<1x128x128xbf16>
    %76 = vector.shape_cast %75 : vector<1x128x128xbf16> to vector<128x128xbf16>
    %cst = arith.constant dense<0.000000e+00> : vector<32x128xf32>
    %77 = tpu.matmul %74, %76, %cst {dimension_numbers = #tpu.dot_dimension_numbers<[1], [0], [0], [1], [0, 0, 1, 1], [], []>} : vector<32x128xbf16>, vector<128x128xbf16>, vector<32x128xf32> -> vector<32x128xf32>
    %c0_8 = arith.constant 0 : index
    %c0_9 = arith.constant 0 : index
    %78 = vector.load %arg4[%c0_8, %c0_9] : memref<3x128xf32, #tpu.memory_space<vmem>>, vector<1x128xf32>
    %79 = vector.broadcast %78 : vector<1x128xf32> to vector<32x128xf32>
    %80 = arith.addf %77, %79 : vector<32x128xf32>
    %cst_10 = arith.constant 0.000000e+00 : f32
    %81 = vector.broadcast %cst_10 : f32 to vector<32x128xf32>
    %82 = arith.maximumf %80, %81 : vector<32x128xf32>
    %83 = arith.truncf %82 : vector<32x128xf32> to vector<32x128xbf16>
    %c0_11 = arith.constant 0 : index
    %c0_12 = arith.constant 0 : index
    %c0_13 = arith.constant 0 : index
    %84 = vector.load %arg5[%c0_11, %c0_12, %c0_13] : memref<3x128x128xbf16, #tpu.memory_space<vmem>>, vector<1x128x128xbf16>
    %85 = vector.shape_cast %84 : vector<1x128x128xbf16> to vector<128x128xbf16>
    %cst_14 = arith.constant dense<0.000000e+00> : vector<32x128xf32>
    %86 = tpu.matmul %83, %85, %cst_14 {dimension_numbers = #tpu.dot_dimension_numbers<[1], [0], [0], [1], [0, 0, 1, 1], [], []>} : vector<32x128xbf16>, vector<128x128xbf16>, vector<32x128xf32> -> vector<32x128xf32>
    %87 = vector.extract_strided_slice %0 {offsets = [0, 1, 2, 0], sizes = [2, 1, 16, 128], strides = [1, 1, 1, 1]} : vector<2x7x24x128xf32> to vector<2x1x16x128xf32>
    %88 = vector.shape_cast %87 : vector<2x1x16x128xf32> to vector<2x16x128xf32>
    %89 = vector.extract_strided_slice %1 {offsets = [9, 0], sizes = [1, 128], strides = [1, 1]} : vector<27x128xf32> to vector<1x128xf32>
    %90 = vector.shape_cast %89 : vector<1x128xf32> to vector<128xf32>
    %91 = vector.shape_cast %90 : vector<128xf32> to vector<1x1x128xf32>
    %92 = vector.broadcast %91 : vector<1x1x128xf32> to vector<2x16x128xf32>
    %93 = arith.mulf %88, %92 : vector<2x16x128xf32>
    %94 = vector.extract_strided_slice %0 {offsets = [0, 3, 2, 0], sizes = [2, 1, 16, 128], strides = [1, 1, 1, 1]} : vector<2x7x24x128xf32> to vector<2x1x16x128xf32>
    %95 = vector.shape_cast %94 : vector<2x1x16x128xf32> to vector<2x16x128xf32>
    %96 = vector.extract_strided_slice %1 {offsets = [10, 0], sizes = [1, 128], strides = [1, 1]} : vector<27x128xf32> to vector<1x128xf32>
    %97 = vector.shape_cast %96 : vector<1x128xf32> to vector<128xf32>
    %98 = vector.shape_cast %97 : vector<128xf32> to vector<1x1x128xf32>
    %99 = vector.broadcast %98 : vector<1x1x128xf32> to vector<2x16x128xf32>
    %100 = arith.mulf %95, %99 : vector<2x16x128xf32>
    %101 = arith.addf %93, %100 : vector<2x16x128xf32>
    %102 = vector.extract_strided_slice %0 {offsets = [0, 5, 2, 0], sizes = [2, 1, 16, 128], strides = [1, 1, 1, 1]} : vector<2x7x24x128xf32> to vector<2x1x16x128xf32>
    %103 = vector.shape_cast %102 : vector<2x1x16x128xf32> to vector<2x16x128xf32>
    %104 = vector.extract_strided_slice %1 {offsets = [11, 0], sizes = [1, 128], strides = [1, 1]} : vector<27x128xf32> to vector<1x128xf32>
    %105 = vector.shape_cast %104 : vector<1x128xf32> to vector<128xf32>
    %106 = vector.shape_cast %105 : vector<128xf32> to vector<1x1x128xf32>
    %107 = vector.broadcast %106 : vector<1x1x128xf32> to vector<2x16x128xf32>
    %108 = arith.mulf %103, %107 : vector<2x16x128xf32>
    %109 = arith.addf %101, %108 : vector<2x16x128xf32>
    %110 = vector.extract_strided_slice %0 {offsets = [0, 1, 4, 0], sizes = [2, 1, 16, 128], strides = [1, 1, 1, 1]} : vector<2x7x24x128xf32> to vector<2x1x16x128xf32>
    %111 = vector.shape_cast %110 : vector<2x1x16x128xf32> to vector<2x16x128xf32>
    %112 = vector.extract_strided_slice %1 {offsets = [12, 0], sizes = [1, 128], strides = [1, 1]} : vector<27x128xf32> to vector<1x128xf32>
    %113 = vector.shape_cast %112 : vector<1x128xf32> to vector<128xf32>
    %114 = vector.shape_cast %113 : vector<128xf32> to vector<1x1x128xf32>
    %115 = vector.broadcast %114 : vector<1x1x128xf32> to vector<2x16x128xf32>
    %116 = arith.mulf %111, %115 : vector<2x16x128xf32>
    %117 = arith.addf %109, %116 : vector<2x16x128xf32>
    %118 = vector.extract_strided_slice %0 {offsets = [0, 3, 4, 0], sizes = [2, 1, 16, 128], strides = [1, 1, 1, 1]} : vector<2x7x24x128xf32> to vector<2x1x16x128xf32>
    %119 = vector.shape_cast %118 : vector<2x1x16x128xf32> to vector<2x16x128xf32>
    %120 = vector.extract_strided_slice %1 {offsets = [13, 0], sizes = [1, 128], strides = [1, 1]} : vector<27x128xf32> to vector<1x128xf32>
    %121 = vector.shape_cast %120 : vector<1x128xf32> to vector<128xf32>
    %122 = vector.shape_cast %121 : vector<128xf32> to vector<1x1x128xf32>
    %123 = vector.broadcast %122 : vector<1x1x128xf32> to vector<2x16x128xf32>
    %124 = arith.mulf %119, %123 : vector<2x16x128xf32>
    %125 = arith.addf %117, %124 : vector<2x16x128xf32>
    %126 = vector.extract_strided_slice %0 {offsets = [0, 5, 4, 0], sizes = [2, 1, 16, 128], strides = [1, 1, 1, 1]} : vector<2x7x24x128xf32> to vector<2x1x16x128xf32>
    %127 = vector.shape_cast %126 : vector<2x1x16x128xf32> to vector<2x16x128xf32>
    %128 = vector.extract_strided_slice %1 {offsets = [14, 0], sizes = [1, 128], strides = [1, 1]} : vector<27x128xf32> to vector<1x128xf32>
    %129 = vector.shape_cast %128 : vector<1x128xf32> to vector<128xf32>
    %130 = vector.shape_cast %129 : vector<128xf32> to vector<1x1x128xf32>
    %131 = vector.broadcast %130 : vector<1x1x128xf32> to vector<2x16x128xf32>
    %132 = arith.mulf %127, %131 : vector<2x16x128xf32>
    %133 = arith.addf %125, %132 : vector<2x16x128xf32>
    %134 = vector.extract_strided_slice %0 {offsets = [0, 1, 6, 0], sizes = [2, 1, 16, 128], strides = [1, 1, 1, 1]} : vector<2x7x24x128xf32> to vector<2x1x16x128xf32>
    %135 = vector.shape_cast %134 : vector<2x1x16x128xf32> to vector<2x16x128xf32>
    %136 = vector.extract_strided_slice %1 {offsets = [15, 0], sizes = [1, 128], strides = [1, 1]} : vector<27x128xf32> to vector<1x128xf32>
    %137 = vector.shape_cast %136 : vector<1x128xf32> to vector<128xf32>
    %138 = vector.shape_cast %137 : vector<128xf32> to vector<1x1x128xf32>
    %139 = vector.broadcast %138 : vector<1x1x128xf32> to vector<2x16x128xf32>
    %140 = arith.mulf %135, %139 : vector<2x16x128xf32>
    %141 = arith.addf %133, %140 : vector<2x16x128xf32>
    %142 = vector.extract_strided_slice %0 {offsets = [0, 3, 6, 0], sizes = [2, 1, 16, 128], strides = [1, 1, 1, 1]} : vector<2x7x24x128xf32> to vector<2x1x16x128xf32>
    %143 = vector.shape_cast %142 : vector<2x1x16x128xf32> to vector<2x16x128xf32>
    %144 = vector.extract_strided_slice %1 {offsets = [16, 0], sizes = [1, 128], strides = [1, 1]} : vector<27x128xf32> to vector<1x128xf32>
    %145 = vector.shape_cast %144 : vector<1x128xf32> to vector<128xf32>
    %146 = vector.shape_cast %145 : vector<128xf32> to vector<1x1x128xf32>
    %147 = vector.broadcast %146 : vector<1x1x128xf32> to vector<2x16x128xf32>
    %148 = arith.mulf %143, %147 : vector<2x16x128xf32>
    %149 = arith.addf %141, %148 : vector<2x16x128xf32>
    %150 = vector.extract_strided_slice %0 {offsets = [0, 5, 6, 0], sizes = [2, 1, 16, 128], strides = [1, 1, 1, 1]} : vector<2x7x24x128xf32> to vector<2x1x16x128xf32>
    %151 = vector.shape_cast %150 : vector<2x1x16x128xf32> to vector<2x16x128xf32>
    %152 = vector.extract_strided_slice %1 {offsets = [17, 0], sizes = [1, 128], strides = [1, 1]} : vector<27x128xf32> to vector<1x128xf32>
    %153 = vector.shape_cast %152 : vector<1x128xf32> to vector<128xf32>
    %154 = vector.shape_cast %153 : vector<128xf32> to vector<1x1x128xf32>
    %155 = vector.broadcast %154 : vector<1x1x128xf32> to vector<2x16x128xf32>
    %156 = arith.mulf %151, %155 : vector<2x16x128xf32>
    %157 = arith.addf %149, %156 : vector<2x16x128xf32>
    %158 = vector.shape_cast %157 : vector<2x16x128xf32> to vector<32x128xf32>
    %159 = arith.truncf %158 : vector<32x128xf32> to vector<32x128xbf16>
    %c1 = arith.constant 1 : index
    %c0_15 = arith.constant 0 : index
    %c0_16 = arith.constant 0 : index
    %160 = vector.load %arg3[%c1, %c0_15, %c0_16] : memref<3x128x128xbf16, #tpu.memory_space<vmem>>, vector<1x128x128xbf16>
    %161 = vector.shape_cast %160 : vector<1x128x128xbf16> to vector<128x128xbf16>
    %cst_17 = arith.constant dense<0.000000e+00> : vector<32x128xf32>
    %162 = tpu.matmul %159, %161, %cst_17 {dimension_numbers = #tpu.dot_dimension_numbers<[1], [0], [0], [1], [0, 0, 1, 1], [], []>} : vector<32x128xbf16>, vector<128x128xbf16>, vector<32x128xf32> -> vector<32x128xf32>
    %c1_18 = arith.constant 1 : index
    %c0_19 = arith.constant 0 : index
    %163 = vector.load %arg4[%c1_18, %c0_19] : memref<3x128xf32, #tpu.memory_space<vmem>>, vector<1x128xf32>
    %164 = vector.broadcast %163 : vector<1x128xf32> to vector<32x128xf32>
    %165 = arith.addf %162, %164 : vector<32x128xf32>
    %cst_20 = arith.constant 0.000000e+00 : f32
    %166 = vector.broadcast %cst_20 : f32 to vector<32x128xf32>
    %167 = arith.maximumf %165, %166 : vector<32x128xf32>
    %168 = arith.truncf %167 : vector<32x128xf32> to vector<32x128xbf16>
    %c1_21 = arith.constant 1 : index
    %c0_22 = arith.constant 0 : index
    %c0_23 = arith.constant 0 : index
    %169 = vector.load %arg5[%c1_21, %c0_22, %c0_23] : memref<3x128x128xbf16, #tpu.memory_space<vmem>>, vector<1x128x128xbf16>
    %170 = vector.shape_cast %169 : vector<1x128x128xbf16> to vector<128x128xbf16>
    %cst_24 = arith.constant dense<0.000000e+00> : vector<32x128xf32>
    %171 = tpu.matmul %168, %170, %cst_24 {dimension_numbers = #tpu.dot_dimension_numbers<[1], [0], [0], [1], [0, 0, 1, 1], [], []>} : vector<32x128xbf16>, vector<128x128xbf16>, vector<32x128xf32> -> vector<32x128xf32>
    %172 = arith.addf %86, %171 : vector<32x128xf32>
    %173 = vector.extract_strided_slice %0 {offsets = [0, 0, 0, 0], sizes = [2, 1, 16, 128], strides = [1, 1, 1, 1]} : vector<2x7x24x128xf32> to vector<2x1x16x128xf32>
    %174 = vector.shape_cast %173 : vector<2x1x16x128xf32> to vector<2x16x128xf32>
    %175 = vector.extract_strided_slice %1 {offsets = [18, 0], sizes = [1, 128], strides = [1, 1]} : vector<27x128xf32> to vector<1x128xf32>
    %176 = vector.shape_cast %175 : vector<1x128xf32> to vector<128xf32>
    %177 = vector.shape_cast %176 : vector<128xf32> to vector<1x1x128xf32>
    %178 = vector.broadcast %177 : vector<1x1x128xf32> to vector<2x16x128xf32>
    %179 = arith.mulf %174, %178 : vector<2x16x128xf32>
    %180 = vector.extract_strided_slice %0 {offsets = [0, 3, 0, 0], sizes = [2, 1, 16, 128], strides = [1, 1, 1, 1]} : vector<2x7x24x128xf32> to vector<2x1x16x128xf32>
    %181 = vector.shape_cast %180 : vector<2x1x16x128xf32> to vector<2x16x128xf32>
    %182 = vector.extract_strided_slice %1 {offsets = [19, 0], sizes = [1, 128], strides = [1, 1]} : vector<27x128xf32> to vector<1x128xf32>
    %183 = vector.shape_cast %182 : vector<1x128xf32> to vector<128xf32>
    %184 = vector.shape_cast %183 : vector<128xf32> to vector<1x1x128xf32>
    %185 = vector.broadcast %184 : vector<1x1x128xf32> to vector<2x16x128xf32>
    %186 = arith.mulf %181, %185 : vector<2x16x128xf32>
    %187 = arith.addf %179, %186 : vector<2x16x128xf32>
    %188 = vector.extract_strided_slice %0 {offsets = [0, 6, 0, 0], sizes = [2, 1, 16, 128], strides = [1, 1, 1, 1]} : vector<2x7x24x128xf32> to vector<2x1x16x128xf32>
    %189 = vector.shape_cast %188 : vector<2x1x16x128xf32> to vector<2x16x128xf32>
    %190 = vector.extract_strided_slice %1 {offsets = [20, 0], sizes = [1, 128], strides = [1, 1]} : vector<27x128xf32> to vector<1x128xf32>
    %191 = vector.shape_cast %190 : vector<1x128xf32> to vector<128xf32>
    %192 = vector.shape_cast %191 : vector<128xf32> to vector<1x1x128xf32>
    %193 = vector.broadcast %192 : vector<1x1x128xf32> to vector<2x16x128xf32>
    %194 = arith.mulf %189, %193 : vector<2x16x128xf32>
    %195 = arith.addf %187, %194 : vector<2x16x128xf32>
    %196 = vector.extract_strided_slice %0 {offsets = [0, 0, 4, 0], sizes = [2, 1, 16, 128], strides = [1, 1, 1, 1]} : vector<2x7x24x128xf32> to vector<2x1x16x128xf32>
    %197 = vector.shape_cast %196 : vector<2x1x16x128xf32> to vector<2x16x128xf32>
    %198 = vector.extract_strided_slice %1 {offsets = [21, 0], sizes = [1, 128], strides = [1, 1]} : vector<27x128xf32> to vector<1x128xf32>
    %199 = vector.shape_cast %198 : vector<1x128xf32> to vector<128xf32>
    %200 = vector.shape_cast %199 : vector<128xf32> to vector<1x1x128xf32>
    %201 = vector.broadcast %200 : vector<1x1x128xf32> to vector<2x16x128xf32>
    %202 = arith.mulf %197, %201 : vector<2x16x128xf32>
    %203 = arith.addf %195, %202 : vector<2x16x128xf32>
    %204 = vector.extract_strided_slice %0 {offsets = [0, 3, 4, 0], sizes = [2, 1, 16, 128], strides = [1, 1, 1, 1]} : vector<2x7x24x128xf32> to vector<2x1x16x128xf32>
    %205 = vector.shape_cast %204 : vector<2x1x16x128xf32> to vector<2x16x128xf32>
    %206 = vector.extract_strided_slice %1 {offsets = [22, 0], sizes = [1, 128], strides = [1, 1]} : vector<27x128xf32> to vector<1x128xf32>
    %207 = vector.shape_cast %206 : vector<1x128xf32> to vector<128xf32>
    %208 = vector.shape_cast %207 : vector<128xf32> to vector<1x1x128xf32>
    %209 = vector.broadcast %208 : vector<1x1x128xf32> to vector<2x16x128xf32>
    %210 = arith.mulf %205, %209 : vector<2x16x128xf32>
    %211 = arith.addf %203, %210 : vector<2x16x128xf32>
    %212 = vector.extract_strided_slice %0 {offsets = [0, 6, 4, 0], sizes = [2, 1, 16, 128], strides = [1, 1, 1, 1]} : vector<2x7x24x128xf32> to vector<2x1x16x128xf32>
    %213 = vector.shape_cast %212 : vector<2x1x16x128xf32> to vector<2x16x128xf32>
    %214 = vector.extract_strided_slice %1 {offsets = [23, 0], sizes = [1, 128], strides = [1, 1]} : vector<27x128xf32> to vector<1x128xf32>
    %215 = vector.shape_cast %214 : vector<1x128xf32> to vector<128xf32>
    %216 = vector.shape_cast %215 : vector<128xf32> to vector<1x1x128xf32>
    %217 = vector.broadcast %216 : vector<1x1x128xf32> to vector<2x16x128xf32>
    %218 = arith.mulf %213, %217 : vector<2x16x128xf32>
    %219 = arith.addf %211, %218 : vector<2x16x128xf32>
    %220 = vector.extract_strided_slice %0 {offsets = [0, 0, 8, 0], sizes = [2, 1, 16, 128], strides = [1, 1, 1, 1]} : vector<2x7x24x128xf32> to vector<2x1x16x128xf32>
    %221 = vector.shape_cast %220 : vector<2x1x16x128xf32> to vector<2x16x128xf32>
    %222 = vector.extract_strided_slice %1 {offsets = [24, 0], sizes = [1, 128], strides = [1, 1]} : vector<27x128xf32> to vector<1x128xf32>
    %223 = vector.shape_cast %222 : vector<1x128xf32> to vector<128xf32>
    %224 = vector.shape_cast %223 : vector<128xf32> to vector<1x1x128xf32>
    %225 = vector.broadcast %224 : vector<1x1x128xf32> to vector<2x16x128xf32>
    %226 = arith.mulf %221, %225 : vector<2x16x128xf32>
    %227 = arith.addf %219, %226 : vector<2x16x128xf32>
    %228 = vector.extract_strided_slice %0 {offsets = [0, 3, 8, 0], sizes = [2, 1, 16, 128], strides = [1, 1, 1, 1]} : vector<2x7x24x128xf32> to vector<2x1x16x128xf32>
    %229 = vector.shape_cast %228 : vector<2x1x16x128xf32> to vector<2x16x128xf32>
    %230 = vector.extract_strided_slice %1 {offsets = [25, 0], sizes = [1, 128], strides = [1, 1]} : vector<27x128xf32> to vector<1x128xf32>
    %231 = vector.shape_cast %230 : vector<1x128xf32> to vector<128xf32>
    %232 = vector.shape_cast %231 : vector<128xf32> to vector<1x1x128xf32>
    %233 = vector.broadcast %232 : vector<1x1x128xf32> to vector<2x16x128xf32>
    %234 = arith.mulf %229, %233 : vector<2x16x128xf32>
    %235 = arith.addf %227, %234 : vector<2x16x128xf32>
    %236 = vector.extract_strided_slice %0 {offsets = [0, 6, 8, 0], sizes = [2, 1, 16, 128], strides = [1, 1, 1, 1]} : vector<2x7x24x128xf32> to vector<2x1x16x128xf32>
    %237 = vector.shape_cast %236 : vector<2x1x16x128xf32> to vector<2x16x128xf32>
    %238 = vector.extract_strided_slice %1 {offsets = [26, 0], sizes = [1, 128], strides = [1, 1]} : vector<27x128xf32> to vector<1x128xf32>
    %239 = vector.shape_cast %238 : vector<1x128xf32> to vector<128xf32>
    %240 = vector.shape_cast %239 : vector<128xf32> to vector<1x1x128xf32>
    %241 = vector.broadcast %240 : vector<1x1x128xf32> to vector<2x16x128xf32>
    %242 = arith.mulf %237, %241 : vector<2x16x128xf32>
    %243 = arith.addf %235, %242 : vector<2x16x128xf32>
    %244 = vector.shape_cast %243 : vector<2x16x128xf32> to vector<32x128xf32>
    %245 = arith.truncf %244 : vector<32x128xf32> to vector<32x128xbf16>
    %c2 = arith.constant 2 : index
    %c0_25 = arith.constant 0 : index
    %c0_26 = arith.constant 0 : index
    %246 = vector.load %arg3[%c2, %c0_25, %c0_26] : memref<3x128x128xbf16, #tpu.memory_space<vmem>>, vector<1x128x128xbf16>
    %247 = vector.shape_cast %246 : vector<1x128x128xbf16> to vector<128x128xbf16>
    %cst_27 = arith.constant dense<0.000000e+00> : vector<32x128xf32>
    %248 = tpu.matmul %245, %247, %cst_27 {dimension_numbers = #tpu.dot_dimension_numbers<[1], [0], [0], [1], [0, 0, 1, 1], [], []>} : vector<32x128xbf16>, vector<128x128xbf16>, vector<32x128xf32> -> vector<32x128xf32>
    %c2_28 = arith.constant 2 : index
    %c0_29 = arith.constant 0 : index
    %249 = vector.load %arg4[%c2_28, %c0_29] : memref<3x128xf32, #tpu.memory_space<vmem>>, vector<1x128xf32>
    %250 = vector.broadcast %249 : vector<1x128xf32> to vector<32x128xf32>
    %251 = arith.addf %248, %250 : vector<32x128xf32>
    %cst_30 = arith.constant 0.000000e+00 : f32
    %252 = vector.broadcast %cst_30 : f32 to vector<32x128xf32>
    %253 = arith.maximumf %251, %252 : vector<32x128xf32>
    %254 = arith.truncf %253 : vector<32x128xf32> to vector<32x128xbf16>
    %c2_31 = arith.constant 2 : index
    %c0_32 = arith.constant 0 : index
    %c0_33 = arith.constant 0 : index
    %255 = vector.load %arg5[%c2_31, %c0_32, %c0_33] : memref<3x128x128xbf16, #tpu.memory_space<vmem>>, vector<1x128x128xbf16>
    %256 = vector.shape_cast %255 : vector<1x128x128xbf16> to vector<128x128xbf16>
    %cst_34 = arith.constant dense<0.000000e+00> : vector<32x128xf32>
    %257 = tpu.matmul %254, %256, %cst_34 {dimension_numbers = #tpu.dot_dimension_numbers<[1], [0], [0], [1], [0, 0, 1, 1], [], []>} : vector<32x128xbf16>, vector<128x128xbf16>, vector<32x128xf32> -> vector<32x128xf32>
    %258 = arith.addf %172, %257 : vector<32x128xf32>
    %c0_35 = arith.constant 0 : index
    %c0_36 = arith.constant 0 : index
    %259 = vector.load %arg6[%c0_35, %c0_36] : memref<1x128xf32, #tpu.memory_space<vmem>>, vector<1x128xf32>
    %260 = vector.broadcast %259 : vector<1x128xf32> to vector<32x128xf32>
    %261 = arith.addf %258, %260 : vector<32x128xf32>
    %cst_37 = arith.constant 0.000000e+00 : f32
    %262 = vector.broadcast %cst_37 : f32 to vector<32x128xf32>
    %263 = arith.maximumf %261, %262 : vector<32x128xf32>
    %264 = vector.shape_cast %263 : vector<32x128xf32> to vector<2x16x128xf32>
    %c0_38 = arith.constant 0 : index
    %c0_39 = arith.constant 0 : index
    %c0_40 = arith.constant 0 : index
    %265 = vector.load %arg7[%c0_38, %c0_39, %c0_40] : memref<2x16x128xf32, #tpu.memory_space<vmem>>, vector<2x16x128xf32>
    tpu.vector_store %arg7[%c0_38, %c0_39, %c0_40], %264 {strides = array<i32>} : memref<2x16x128xf32, #tpu.memory_space<vmem>>, vector<2x16x128xf32>,
    return
  }
  func.func @transform_0(%arg0: i32) -> (i32, i32, i32, i32) {
    %c0_i32 = arith.constant 0 : i32
    %c0_i32_0 = arith.constant 0 : i32
    %c0_i32_1 = arith.constant 0 : i32
    %c0_i32_2 = arith.constant 0 : i32
    return %arg0, %c0_i32, %c0_i32_0, %c0_i32_1 : i32, i32, i32, i32
  }
  func.func @transform_1(%arg0: i32) -> (i32, i32) {
    %c0_i32 = arith.constant 0 : i32
    %c0_i32_0 = arith.constant 0 : i32
    %c0_i32_1 = arith.constant 0 : i32
    return %c0_i32, %c0_i32_0 : i32, i32
  }
  func.func @transform_2(%arg0: i32) -> (i32, i32, i32) {
    %c0_i32 = arith.constant 0 : i32
    %c0_i32_0 = arith.constant 0 : i32
    %c0_i32_1 = arith.constant 0 : i32
    %c0_i32_2 = arith.constant 0 : i32
    return %c0_i32, %c0_i32_0, %c0_i32_1 : i32, i32, i32
  }
  func.func @transform_3(%arg0: i32) -> (i32, i32) {
    %c0_i32 = arith.constant 0 : i32
    %c0_i32_0 = arith.constant 0 : i32
    %c0_i32_1 = arith.constant 0 : i32
    return %c0_i32, %c0_i32_0 : i32, i32
  }
  func.func @transform_4(%arg0: i32) -> (i32, i32, i32) {
    %c0_i32 = arith.constant 0 : i32
    %c0_i32_0 = arith.constant 0 : i32
    %c0_i32_1 = arith.constant 0 : i32
    %c0_i32_2 = arith.constant 0 : i32
    return %c0_i32, %c0_i32_0, %c0_i32_1 : i32, i32, i32
  }
  func.func @transform_5(%arg0: i32) -> (i32, i32) {
    %c0_i32 = arith.constant 0 : i32
    %c0_i32_0 = arith.constant 0 : i32
    %c0_i32_1 = arith.constant 0 : i32
    return %c0_i32, %c0_i32_0 : i32, i32
  }
  func.func @transform_6(%arg0: i32) -> (i32, i32, i32) {
    %c0_i32 = arith.constant 0 : i32
    %c0_i32_0 = arith.constant 0 : i32
    %c0_i32_1 = arith.constant 0 : i32
    return %arg0, %c0_i32, %c0_i32_0 : i32, i32, i32
  }
}

</mosaic_0001>

<bundles_post_ra>
// kernel: dpblock3_forward.1
= control target key start
LH: loop header
LB: loop body
LE: loop exit
PB: predicated region body
PF: predicated region fallthrough
CT: control target
= control target key end

     0   :  { %vm115_vm0 = vcmask 1046528   ;;  %vm221_vm1 = vcmask 1045504   ;;  %vm320_vm2 = vcmask 1044480   ;;  %vm595_vm3 = vcmask 1043456   ;;  %s2496_s2 = inlined_call_operand.vmem [shape: bf16[3,128,128], index: 2, kind: input, shape index: {}]   ;;  %s2497_s0 = inlined_call_operand.vmem [shape: f32[2,7,24,128], index: 0, kind: input, shape index: {}]   ;;  %s2498_s1 = inlined_call_operand.vmem [shape: f32[27,128], index: 1, kind: input, shape index: {}]   ;;  %s2499_s3 = inlined_call_operand.vmem [shape: f32[3,128], index: 3, kind: input, shape index: {}]   ;;  %s2500_s4 = inlined_call_operand.vmem [shape: bf16[3,128,128], index: 4, kind: input, shape index: {}]   ;;  %s2501_s5 = inlined_call_operand.vmem [shape: f32[1,128], index: 5, kind: input, shape index: {}]   ;;  %s2502_s6 = inlined_call_operand.vmem [shape: f32[2,16,128], index: 6, kind: output, shape index: {}]  }
   0x1   :  { %v1561_v0 = vld [vmem:[%s2496_s2 + $0x38] sm:$0xff]  ;;  %v1560_v2 = vld [vmem:[%s2496_s2 + $0x30] sm:$0xff]  ;;  %v1559_v4 = vld [vmem:[%s2496_s2 + $0x28] sm:$0xff] }
   0x2   :  { %v1577_v1 = vld [vmem:[%s2496_s2 + $0x78] sm:$0xff]  ;;  %403 = vmatpush.bf16.msra.mxu0 %v1561_v0  ;;  %v1576_v3 = vld [vmem:[%s2496_s2 + $0x70] sm:$0xff]  ;;  %v1575_v5 = vld [vmem:[%s2496_s2 + $0x68] sm:$0xff] }
   0x3   :  { %777 = vmatpush.bf16.msra.mxu1 %v1577_v1  ;;  %v1680_v6 = vld [vmem:[%s2497_s0 + $0x30] sm:$0xff]  ;;  %v1685_v7 = vld [vmem:[%s2497_s0 + $0x38] sm:$0xff]  ;;  %v1690_v8 = vld [vmem:[%s2497_s0 + $0x40] sm:$0xff] }
   0x4   :  { %v1695_v9 = vld [vmem:[%s2497_s0 + $0x48] sm:$0xff]  ;;  %v1558_v10 = vld [vmem:[%s2496_s2 + $0x20] sm:$0xff]  ;;  %v1703_v11 = vld [vmem:[%s2497_s0 + $0x50] sm:$0xff] }
   0x5   :  { %v1708_v12 = vld [vmem:[%s2497_s0 + $0x58] sm:$0xff]  ;;  %v65_v13 = vld [vmem:[%s2498_s1] sm:$0xff]  ;;  %v1721_v15 = vld [vmem:[%s2497_s0 + $0x68] sm:$0xff] }
   0x6   :  { %404 = vmatpush.bf16.msra.mxu0 %v1560_v2  ;;  %v1716_v14 = vld [vmem:[%s2497_s0 + $0x60] sm:$0xff]  ;;  %v1723_v16 = vperm.slane %v65_v13, 0  ;;  %v1725_v17 = vperm.slane %v65_v13, 1  ;;  %v1727_v18 = vperm.slane %v65_v13, 2  ;;  %v1729_v19 = vperm.slane %v65_v13, 3  ;;  %v1737_v21 = vld [vmem:[%s2497_s0 + $0x70] sm:$0xff] }
   0x7   :  { %778 = vmatpush.bf16.msra.mxu1 %v1576_v3  ;;  %v1574_v20 = vld [vmem:[%s2496_s2 + $0x60] sm:$0xff]  ;;  %v1739_v22 = vperm.slane %v65_v13, 4  ;;  %v1741_v23 = vperm.slane %v65_v13, 5  ;;  %v1743_v24 = vperm.slane %v65_v13, 6  ;;  %v1745_v25 = vperm.slane %v65_v13, 7  ;;  %v1766_v34 = vld [vmem:[%s2498_s1 + $0x8] sm:$0xff] }
   0x8   :  { %v70_v26 = vmul.f32 %v1723_v16, %v1680_v6  ;;  %v71_v27 = vmul.f32 %v1723_v16, %v1685_v7  ;;  %v72_v28 = vmul.f32 %v1723_v16, %v1690_v8  ;;  %v77_v29 = vmul.f32 %v1725_v17, %v1695_v9  ;;  %v1557_v39 = vld [vmem:[%s2496_s2 + $0x18] sm:$0xff]  ;;  %v1556_v57 = vld [vmem:[%s2496_s2 + $0x10] sm:$0xff] }
   0x9   :  { %v78_v30 = vmul.f32 %v1725_v17, %v1703_v11  ;;  %v79_v31 = vmul.f32 %v1725_v17, %v1708_v12  ;;  %v90_v32 = vmul.f32 %v1727_v18, %v1716_v14  ;;  %v91_v33 = vmul.f32 %v1727_v18, %v1721_v15  ;;  %v1573_v40 = vld [vmem:[%s2496_s2 + $0x58] sm:$0xff]  ;;  %v1572_v58 = vld [vmem:[%s2496_s2 + $0x50] sm:$0xff] }
   0xa   :  { %405 = vmatpush.bf16.msra.mxu0 %v1559_v4  ;;  %v83_v35 = vadd.f32 %v77_v29, %v70_v26  ;;  %v92_v36 = vmul.f32 %v1727_v18, %v1737_v21  ;;  %v103_v37 = vmul.f32 %v1729_v19, %v1680_v6  ;;  %v104_v38 = vmul.f32 %v1729_v19, %v1685_v7  ;;  %v1571_v29 = vld [vmem:[%s2496_s2 + $0x48] sm:$0xff] }
   0xb   :  { %779 = vmatpush.bf16.msra.mxu1 %v1575_v5  ;;  %v84_v41 = vadd.f32 %v78_v30, %v71_v27  ;;  %v85_v42 = vadd.f32 %v79_v31, %v72_v28  ;;  %v105_v43 = vmul.f32 %v1729_v19, %v1690_v8  ;;  %v1783_v44 = vperm.slane %v1766_v34, 0  ;;  %v1555_v28 = vld [vmem:[%s2496_s2 + $0x8] sm:$0xff] }
   0xc   :  { %v96_v45 = vadd.f32 %v90_v32, %v83_v35  ;;  %v116_v46 = vrot.slane %v103_v37, 1  ;;  %v117_v47 = vrot.slane %v104_v38, 1  ;;  %v139_v48 = vmul.f32 %v1739_v22, %v1695_v9 }
   0xd   :  { %v97_v49 = vadd.f32 %v91_v33, %v84_v41  ;;  %v98_v50 = vadd.f32 %v92_v36, %v85_v42  ;;  %v119_v51 = vrot.slane %v105_v43, 1  ;;  %v140_v52 = vmul.f32 %v1739_v22, %v1703_v11 }
   0xe   :  { %406 = vmatpush.bf16.msra.mxu0 %v1558_v10  ;;  %v118_v53 = vsel %vm115_vm0, %v116_v46, %v117_v47  ;;  %v141_v54 = vmul.f32 %v1739_v22, %v1708_v12  ;;  %v151_v55 = vrot.slane %v139_v48, 1  ;;  %v174_v56 = vmul.f32 %v1741_v23, %v1716_v14  ;;  %v1570_v46 = vld [vmem:[%s2496_s2 + $0x40] sm:$0xff] }
   0xf   :  { %780 = vmatpush.bf16.msra.mxu1 %v1574_v20  ;;  %v120_v59 = vsel %vm115_vm0, %v117_v47, %v119_v51  ;;  %v132_v60 = vadd.f32 %v118_v53, %v96_v45  ;;  %v134_v61 = vadd.f32 %v119_v51, %v98_v50  ;;  %v152_v62 = vrot.slane %v140_v52, 1  ;;  %v1554_v45 = vld [vmem:[%s2496_s2] sm:$0xff] }
  0x10   :  { %v133_v63 = vadd.f32 %v120_v59, %v97_v49  ;;  %v154_v0 = vrot.slane %v141_v54, 1  ;;  %v175_v1 = vmul.f32 %v1741_v23, %v1721_v15  ;;  %v176_v2 = vmul.f32 %v1741_v23, %v1737_v21 }
  0x11   :  { %v153_v3 = vsel %vm115_vm0, %v151_v55, %v152_v62  ;;  %v186_v4 = vrot.slane %v174_v56, 1  ;;  %v209_v5 = vmul.f32 %v1743_v24, %v1680_v6  ;;  %v210_v10 = vmul.f32 %v1743_v24, %v1685_v7  ;;  %v1842_v55 = vld [vmem:[%s2497_s0 + $0x18] sm:$0xff] }
  0x12   :  { %407 = vmatpush.bf16.msra.mxu0 %v1557_v39  ;;  %v155_v13 = vsel %vm115_vm0, %v152_v62, %v154_v0  ;;  %v167_v20 = vadd.f32 %v153_v3, %v132_v60  ;;  %v169_v26 = vadd.f32 %v154_v0, %v134_v61  ;;  %v187_v27 = vrot.slane %v175_v1, 1 }
  0x13   :  { %781 = vmatpush.bf16.msra.mxu1 %v1573_v40  ;;  %v168_v30 = vadd.f32 %v155_v13, %v133_v63  ;;  %v189_v6 = vrot.slane %v176_v2, 1  ;;  %v211_v7 = vmul.f32 %v1743_v24, %v1690_v8  ;;  %v222_v31 = vrot.slane %v209_v5, 2 }
  0x14   :  { %v188_v32 = vsel %vm115_vm0, %v186_v4, %v187_v27  ;;  %v223_v33 = vrot.slane %v210_v10, 2  ;;  %v245_v35 = vmul.f32 %v1745_v25, %v1695_v9  ;;  %v246_v36 = vmul.f32 %v1745_v25, %v1703_v11 }
  0x15   :  { %v190_v37 = vsel %vm115_vm0, %v187_v27, %v189_v6  ;;  %v202_v38 = vadd.f32 %v188_v32, %v167_v20  ;;  %v204_v39 = vadd.f32 %v189_v6, %v169_v26  ;;  %v225_v40 = vrot.slane %v211_v7, 2  ;;  %v1886_v6 = vld [vmem:[%s2497_s0 + $0x78] sm:$0xff]  ;;  %v1891_v7 = vld [vmem:[%s2497_s0 + $0x80] sm:$0xff] }
  0x16   :  { %408 = vmatpush.bf16.msra.mxu0 %v1556_v57  ;;  %v203_v41 = vadd.f32 %v190_v37, %v168_v30  ;;  %v224_v42 = vsel %vm221_vm1, %v222_v31, %v223_v33  ;;  %v247_v8 = vmul.f32 %v1745_v25, %v1708_v12  ;;  %v257_v43 = vrot.slane %v245_v35, 2  ;;  %v1896_v31 = vld [vmem:[%s2497_s0 + $0x88] sm:$0xff] }
  0x17   :  { %782 = vmatpush.bf16.msra.mxu1 %v1572_v58  ;;  %v226_v47 = vsel %vm221_vm1, %v223_v33, %v225_v40  ;;  %v238_v48 = vadd.f32 %v224_v42, %v202_v38  ;;  %v240_v49 = vadd.f32 %v225_v40, %v204_v39  ;;  %v258_v50 = vrot.slane %v246_v36, 2  ;;  %v1850_v58 = vld [vmem:[%s2497_s0 + $0x20] sm:$0xff]  ;;  %v1908_v39 = vld [vmem:[%s2496_s2 + $0xb0] sm:$0xff] }
  0x18   :  { %v239_v51 = vadd.f32 %v226_v47, %v203_v41  ;;  %v260_v52 = vrot.slane %v247_v8, 2  ;;  %v280_v53 = vmul.f32 %v1783_v44, %v1716_v14  ;;  %v281_v54 = vmul.f32 %v1783_v44, %v1721_v15  ;;  %v1855_v14 = vld [vmem:[%s2497_s0 + $0x28] sm:$0xff] }
  0x19   :  { %v259_v56 = vsel %vm221_vm1, %v257_v43, %v258_v50  ;;  %v282_v57 = vmul.f32 %v1783_v44, %v1737_v21  ;;  %v1858_v15 = vperm.slane %v1766_v34, 1  ;;  %v1861_v59 = vperm.slane %v1766_v34, 2 }
  0x1a   :  { %409 = vmatpush.bf16.msra.mxu0 %v1555_v28  ;;  %v261_v60 = vsel %vm221_vm1, %v258_v50, %v260_v52  ;;  %v273_v61 = vadd.f32 %v259_v56, %v238_v48  ;;  %v275_v21 = vadd.f32 %v260_v52, %v240_v49  ;;  %v292_v62 = vrot.slane %v280_v53, 2  ;;  %v1881_v28 = vld [vmem:[%s2496_s2 + $0xb8] sm:$0xff] }
  0x1b   :  { %783 = vmatpush.bf16.msra.mxu1 %v1571_v29  ;;  %v274_v63 = vadd.f32 %v261_v60, %v239_v51  ;;  %v293_v0 = vrot.slane %v281_v54, 2  ;;  %v295_v1 = vrot.slane %v282_v57, 2  ;;  %v445_v2 = vmul.f32 %v1858_v15, %v1842_v55  ;;  %v1934_v57 = vld [vmem:[%s2496_s2 + $0xa8] sm:$0xff] }
  0x1c   :  { %v446_v3 = vmul.f32 %v1858_v15, %v1850_v58  ;;  %v447_v4 = vmul.f32 %v1858_v15, %v1855_v14  ;;  %v452_v5 = vmul.f32 %v1861_v59, %v1695_v9  ;;  %v453_v10 = vmul.f32 %v1861_v59, %v1703_v11 }
  0x1d   :  { %v294_v13 = vsel %vm221_vm1, %v292_v62, %v293_v0  ;;  %v296_v20 = vsel %vm221_vm1, %v293_v0, %v295_v1  ;;  %v310_v26 = vadd.f32 %v295_v1, %v275_v21  ;;  %v454_v27 = vmul.f32 %v1861_v59, %v1708_v12 }
  0x1e   :  { %410 = vmatpush.bf16.msra.mxu0 %v1554_v45  ;;  %v308_v29 = vadd.f32 %v294_v13, %v273_v61  ;;  %v309_v30 = vadd.f32 %v296_v20, %v274_v63  ;;  %v458_v32 = vadd.f32 %v452_v5, %v445_v2  ;;  %v459_v33 = vadd.f32 %v453_v10, %v446_v3 }
  0x1f   :  { %784 = vmatpush.bf16.msra.mxu1 %v1570_v46  ;;  %v324_v35 = vrot.slane %v310_v26, 3  ;;  %v460_v36 = vadd.f32 %v454_v27, %v447_v4  ;;  %v1899_v37 = vperm.slane %v1766_v34, 3  ;;  %v1902_v38 = vperm.slane %v1766_v34, 4 }
  0x20   :  { %v321_v40 = vrot.slane %v308_v29, 3  ;;  %v322_v41 = vrot.slane %v309_v30, 3  ;;  %v1911_v42 = vperm.slane %v1766_v34, 5  ;;  %v1914_v8 = vperm.slane %v1766_v34, 6  ;;  %v1952_v29 = vld [vmem:[%s2496_s2 + $0xa0] sm:$0xff]  ;;  %v1957_v30 = vld [vmem:[%s2498_s1 + $0x10] sm:$0xff] }
  0x21   :  { %v465_v43 = vmul.f32 %v1899_v37, %v1886_v6  ;;  %v466_v45 = vmul.f32 %v1899_v37, %v1891_v7  ;;  %v467_v46 = vmul.f32 %v1899_v37, %v1896_v31  ;;  %v478_v47 = vmul.f32 %v1902_v38, %v1842_v55 }
  0x22   :  { %1165 = vmatpush.bf16.msrb.mxu0 %v1881_v28  ;;  %v323_v48 = vsel %vm320_vm2, %v321_v40, %v322_v41  ;;  %v325_v49 = vsel %vm320_vm2, %v322_v41, %v324_v35  ;;  %v479_v50 = vmul.f32 %v1902_v38, %v1850_v58  ;;  %v480_v51 = vmul.f32 %v1902_v38, %v1855_v14 }
  0x23   :  { %v335_v52 = vpack.c.bf16 %v325_v49, %v323_v48  ;;  %v471_v53 = vadd.f32 %v465_v43, %v458_v32  ;;  %v472_v54 = vadd.f32 %v466_v45, %v459_v33  ;;  %v473_v56 = vadd.f32 %v467_v46, %v460_v36 }
  0x24   :  { %v490_v60 = vrot.slane %v478_v47, 2  ;;  %v491_v61 = vrot.slane %v479_v50, 2  ;;  %v493_v21 = vrot.slane %v480_v51, 2  ;;  %v513_v62 = vmul.f32 %v1911_v42, %v1695_v9 }
  0x25   :  { %411 = vmatmul.bf16.vlgmr.msra.gmra.mxu0 %v335_v52  ;;  %v514_v63 = vmul.f32 %v1911_v42, %v1703_v11  ;;  %v515_v0 = vmul.f32 %v1911_v42, %v1708_v12  ;;  %v548_v1 = vmul.f32 %v1914_v8, %v1886_v6  ;;  %v549_v2 = vmul.f32 %v1914_v8, %v1891_v7 }
  0x26   :  { %1166 = vmatpush.bf16.msrb.mxu0 %v1908_v39  ;;  %v492_v3 = vsel %vm221_vm1, %v490_v60, %v491_v61  ;;  %v494_v4 = vsel %vm221_vm1, %v491_v61, %v493_v21  ;;  %v508_v5 = vadd.f32 %v493_v21, %v473_v56  ;;  %v525_v10 = vrot.slane %v513_v62, 2 }
  0x27   :  { %v506_v13 = vadd.f32 %v492_v3, %v471_v53  ;;  %v507_v20 = vadd.f32 %v494_v4, %v472_v54  ;;  %v526_v26 = vrot.slane %v514_v63, 2  ;;  %v528_v27 = vrot.slane %v515_v0, 2  ;;  %v1996_v4 = vld [vmem:[%s2497_s0 + $0xd8] sm:$0xff] }
  0x28   :  { %v550_v32 = vmul.f32 %v1914_v8, %v1896_v31  ;;  %v560_v33 = vrot.slane %v548_v1, 2  ;;  %v561_v35 = vrot.slane %v549_v2, 2  ;;  %v1962_v36 = vperm.slane %v1766_v34, 7 }
  0x29   :  { %v527_v40 = vsel %vm221_vm1, %v525_v10, %v526_v26  ;;  %v529_v41 = vsel %vm221_vm1, %v526_v26, %v528_v27  ;;  %v543_v43 = vadd.f32 %v528_v27, %v508_v5  ;;  %v1974_v51 = vperm.slane %v1957_v30, 0  ;;  %v2001_v5 = vld [vmem:[%s2497_s0 + $0xe0] sm:$0xff] }
  0x2a   :  { %1167 = vmatpush.bf16.msrb.mxu0 %v1934_v57  ;;  %v541_v45 = vadd.f32 %v527_v40, %v506_v13  ;;  %v542_v46 = vadd.f32 %v529_v41, %v507_v20  ;;  %v562_v47 = vsel %vm221_vm1, %v560_v33, %v561_v35  ;;  %v563_v48 = vrot.slane %v550_v32, 2  ;;  %v2018_v40 = vld [vmem:[%s2497_s0 + $0xf8] sm:$0xff] }
  0x2b   :  { %v583_v49 = vmul.f32 %v1962_v36, %v1842_v55  ;;  %v584_v50 = vmul.f32 %v1962_v36, %v1850_v58  ;;  %v585_v34 = vmul.f32 %v1962_v36, %v1855_v14  ;;  %v1979_v56 = vperm.slane %v1957_v30, 1 }
  0x2c   :  { %v564_v52 = vsel %vm221_vm1, %v561_v35, %v563_v48  ;;  %v576_v53 = vadd.f32 %v562_v47, %v541_v45  ;;  %v578_v54 = vadd.f32 %v563_v48, %v543_v43  ;;  %v619_v58 = vmul.f32 %v1974_v51, %v1695_v9  ;;  %v2013_v35 = vld [vmem:[%s2497_s0 + $0xf0] sm:$0xff]  ;;  %v2024_v43 = vld [vmem:[%s2497_s0 + $0x100] sm:$0xff] }
  0x2d   :  { %v577_v60 = vadd.f32 %v564_v52, %v542_v46  ;;  %v596_v55 = vrot.slane %v583_v49, 4  ;;  %v597_v61 = vrot.slane %v584_v50, 4  ;;  %v599_v21 = vrot.slane %v585_v34, 4  ;;  %v2034_v45 = vld [vmem:[%s2497_s0 + $0x110] sm:$0xff] }
  0x2e   :  { %1168 = vmatpush.bf16.msrb.mxu0 %v1952_v29  ;;  %v620_v14 = vmul.f32 %v1974_v51, %v1703_v11  ;;  %v621_v62 = vmul.f32 %v1974_v51, %v1708_v12  ;;  %v654_v63 = vmul.f32 %v1979_v56, %v1886_v6  ;;  %v655_v3 = vmul.f32 %v1979_v56, %v1891_v7  ;;  %v2006_v6 = vld [vmem:[%s2497_s0 + $0xe8] sm:$0xff] }
  0x2f   :  { %v598_v0 = vsel %vm595_vm3, %v596_v55, %v597_v61  ;;  %v600_v1 = vsel %vm595_vm3, %v597_v61, %v599_v21  ;;  %v614_v2 = vadd.f32 %v599_v21, %v578_v54  ;;  %v631_v20 = vrot.slane %v619_v58, 4 }
  0x30   :  { %v612_v10 = vadd.f32 %v598_v0, %v576_v53  ;;  %v613_v13 = vadd.f32 %v600_v1, %v577_v60  ;;  %v632_v26 = vrot.slane %v620_v14, 4  ;;  %v634_v7 = vrot.slane %v621_v62, 4  ;;  %v2047_v60 = vld [vmem:[%s2497_s0 + $0x118] sm:$0xff] }
  0x31   :  { %v656_v27 = vmul.f32 %v1979_v56, %v1896_v31  ;;  %v666_v32 = vrot.slane %v654_v63, 4  ;;  %v667_v33 = vrot.slane %v655_v3, 4  ;;  %v2029_v31 = vld [vmem:[%s2497_s0 + $0x108] sm:$0xff]  ;;  %v73_v46 = vmul.f32 %v1723_v16, %v1996_v4 }
  0x32   :  { %v633_v41 = vsel %vm595_vm3, %v631_v20, %v632_v26  ;;  %v74_v47 = vmul.f32 %v1723_v16, %v2001_v5  ;;  %v75_v48 = vmul.f32 %v1723_v16, %v2006_v6  ;;  %v635_v49 = vsel %vm595_vm3, %v632_v26, %v634_v7 }
  0x33   :  { %v647_v50 = vadd.f32 %v633_v41, %v612_v10  ;;  %v649_v34 = vadd.f32 %v634_v7, %v614_v2  ;;  %v668_v52 = vsel %vm595_vm3, %v666_v32, %v667_v33  ;;  %v648_v53 = vadd.f32 %v635_v49, %v613_v13 }
  0x34   :  { %v669_v54 = vrot.slane %v656_v27, 4  ;;  %v80_v55 = vmul.f32 %v1725_v17, %v2013_v35  ;;  %v81_v61 = vmul.f32 %v1725_v17, %v2018_v40  ;;  %v82_v21 = vmul.f32 %v1725_v17, %v2024_v43 }
  0x35   :  { %v682_v16 = vadd.f32 %v668_v52, %v647_v50  ;;  %v93_v58 = vmul.f32 %v1727_v18, %v2029_v31  ;;  %v94_v14 = vmul.f32 %v1727_v18, %v2034_v45  ;;  %v95_v13 = vmul.f32 %v1727_v18, %v2047_v60 }
  0x36   :  { %v670_v62 = vsel %vm595_vm3, %v667_v33, %v669_v54  ;;  %v684_v63 = vadd.f32 %v669_v54, %v649_v34  ;;  %v86_v0 = vadd.f32 %v80_v55, %v73_v46  ;;  %v87_v1 = vadd.f32 %v81_v61, %v74_v47 }
  0x37   :  { %v683_v2 = vadd.f32 %v670_v62, %v648_v53  ;;  %v694_v3 = vrot.slane %v682_v16, 2  ;;  %v88_v10 = vadd.f32 %v82_v21, %v75_v48  ;;  %v106_v7 = vmul.f32 %v1729_v19, %v1996_v4 }
  0x38   :  { %v697_v20 = vrot.slane %v684_v63, 2  ;;  %v99_v26 = vadd.f32 %v93_v58, %v86_v0  ;;  %v100_v17 = vadd.f32 %v94_v14, %v87_v1  ;;  %v107_v33 = vmul.f32 %v1729_v19, %v2001_v5 }
  0x39   :  { %v695_v27 = vrot.slane %v683_v2, 2  ;;  %v101_v32 = vadd.f32 %v95_v13, %v88_v10  ;;  %v108_v41 = vmul.f32 %v1729_v19, %v2006_v6  ;;  %v121_v46 = vrot.slane %v106_v7, 1 }
  0x3a   :  { %v142_v47 = vmul.f32 %v1739_v22, %v2013_v35  ;;  %v143_v18 = vmul.f32 %v1739_v22, %v2018_v40  ;;  %v144_v48 = vmul.f32 %v1739_v22, %v2024_v43  ;;  %v122_v34 = vrot.slane %v107_v33, 1 }
  0x3b   :  { %v696_v49 = vsel %vm221_vm1, %v694_v3, %v695_v27  ;;  %v698_v50 = vsel %vm221_vm1, %v695_v27, %v697_v20  ;;  %v124_v52 = vrot.slane %v108_v41, 1  ;;  %v177_v58 = vmul.f32 %v1741_v23, %v2029_v31 }
  0x3c   :  { %v708_v53 = vpack.c.bf16 %v698_v50, %v696_v49  ;;  %v156_v54 = vrot.slane %v142_v47, 1  ;;  %v157_v55 = vrot.slane %v143_v18, 1  ;;  %v159_v19 = vrot.slane %v144_v48, 1 }
  0x3d   :  { %v123_v61 = vsel %vm115_vm0, %v121_v46, %v122_v34  ;;  %v125_v16 = vsel %vm115_vm0, %v122_v34, %v124_v52  ;;  %v137_v21 = vadd.f32 %v124_v52, %v101_v32  ;;  %v178_v1 = vmul.f32 %v1741_v23, %v2034_v45 }
  0x3e   :  { %785 = vmatmul.bf16.vlgmr.msra.gmra.mxu1 %v708_v53  ;;  %v135_v22 = vadd.f32 %v123_v61, %v99_v26  ;;  %v136_v14 = vadd.f32 %v125_v16, %v100_v17  ;;  %v158_v62 = vsel %vm115_vm0, %v156_v54, %v157_v55  ;;  %v160_v63 = vsel %vm115_vm0, %v157_v55, %v159_v19  ;;  %v2109_v61 = vld [vmem:[%s2497_s0 + $0xc0] sm:$0xff]  ;;  %v2114_v16 = vld [vmem:[%s2497_s0 + $0xc8] sm:$0xff] }
  0x3f   :  { %v172_v0 = vadd.f32 %v159_v19, %v137_v21  ;;  %v179_v2 = vmul.f32 %v1741_v23, %v2047_v60  ;;  %v191_v3 = vrot.slane %v177_v58, 1  ;;  %v212_v20 = vmul.f32 %v1743_v24, %v1996_v4  ;;  %v2119_v21 = vld [vmem:[%s2497_s0 + $0xd0] sm:$0xff] }
  0x40   :  { %v170_v10 = vadd.f32 %v158_v62, %v135_v22  ;;  %v171_v13 = vadd.f32 %v160_v63, %v136_v14  ;;  %v213_v26 = vmul.f32 %v1743_v24, %v2001_v5  ;;  %v192_v17 = vrot.slane %v178_v1, 1  ;;  %v2128_v14 = vld [vmem:[%s2496_s2 + $0x98] sm:$0xff] }
  0x41   :  { %v194_v7 = vrot.slane %v179_v2, 1  ;;  %v214_v27 = vmul.f32 %v1743_v24, %v2006_v6  ;;  %v248_v32 = vmul.f32 %v1745_v25, %v2013_v35  ;;  %v227_v33 = vrot.slane %v212_v20, 2  ;;  %v2133_v2 = vld [vmem:[%s2497_s0 + $0x120] sm:$0xff]  ;;  %1169 = vmatpush.bf16.msrb.mxu0 %v2128_v14 }
  0x42   :  { %v228_v41 = vrot.slane %v213_v26, 2  ;;  %v249_v23 = vmul.f32 %v1745_v25, %v2018_v40  ;;  %v250_v46 = vmul.f32 %v1745_v25, %v2024_v43  ;;  %v193_v4 = vsel %vm115_vm0, %v191_v3, %v192_v17  ;;  %v2151_v26 = vld [vmem:[%s2497_s0 + $0x128] sm:$0xff] }
  0x43   :  { %v195_v5 = vsel %vm115_vm0, %v192_v17, %v194_v7  ;;  %v207_v47 = vadd.f32 %v194_v7, %v172_v0  ;;  %v230_v18 = vrot.slane %v214_v27, 2  ;;  %v205_v48 = vadd.f32 %v193_v4, %v170_v10  ;;  %v2156_v17 = vld [vmem:[%s2497_s0 + $0x130] sm:$0xff] }
  0x44   :  { %v206_v49 = vadd.f32 %v195_v5, %v171_v13  ;;  %v229_v24 = vsel %vm221_vm1, %v227_v33, %v228_v41  ;;  %v262_v6 = vrot.slane %v248_v32, 2  ;;  %v263_v52 = vrot.slane %v249_v23, 2  ;;  %v2145_v13 = vld [vmem:[%s2496_s2 + $0x90] sm:$0xff] }
  0x45   :  { %v231_v50 = vsel %vm221_vm1, %v228_v41, %v230_v18  ;;  %v243_v34 = vadd.f32 %v230_v18, %v207_v47  ;;  %v265_v53 = vrot.slane %v250_v46, 2  ;;  %v241_v54 = vadd.f32 %v229_v24, %v205_v48  ;;  %1170 = vmatpush.bf16.msrb.mxu0 %v2145_v13 }
  0x46   :  { %v242_v55 = vadd.f32 %v231_v50, %v206_v49  ;;  %v283_v25 = vmul.f32 %v1783_v44, %v2029_v31  ;;  %v284_v19 = vmul.f32 %v1783_v44, %v2034_v45  ;;  %v264_v31 = vsel %vm221_vm1, %v262_v6, %v263_v52 }
  0x47   :  { %v266_v58 = vsel %vm221_vm1, %v263_v52, %v265_v53  ;;  %v278_v45 = vadd.f32 %v265_v53, %v243_v34  ;;  %v285_v22 = vmul.f32 %v1783_v44, %v2047_v60  ;;  %v276_v62 = vadd.f32 %v264_v31, %v241_v54 }
  0x48   :  { %v277_v63 = vadd.f32 %v266_v58, %v242_v55  ;;  %v297_v0 = vrot.slane %v283_v25, 2  ;;  %v298_v1 = vrot.slane %v284_v19, 2  ;;  %v448_v10 = vmul.f32 %v1858_v15, %v2109_v61 }
  0x49   :  { %v300_v3 = vrot.slane %v285_v22, 2  ;;  %v449_v44 = vmul.f32 %v1858_v15, %v2114_v16  ;;  %v450_v60 = vmul.f32 %v1858_v15, %v2119_v21  ;;  %v455_v15 = vmul.f32 %v1861_v59, %v2013_v35 }
  0x4a   :  { %v299_v20 = vsel %vm221_vm1, %v297_v0, %v298_v1  ;;  %v456_v7 = vmul.f32 %v1861_v59, %v2018_v40  ;;  %v457_v27 = vmul.f32 %v1861_v59, %v2024_v43  ;;  %v468_v23 = vmul.f32 %v1899_v37, %v2133_v2  ;;  %v2175_v59 = vld [vmem:[%s2496_s2 + $0x88] sm:$0xff] }
  0x4b   :  { %v301_v32 = vsel %vm221_vm1, %v298_v1, %v300_v3  ;;  %v311_v33 = vadd.f32 %v299_v20, %v276_v62  ;;  %v313_v41 = vadd.f32 %v300_v3, %v278_v45  ;;  %v461_v4 = vadd.f32 %v455_v15, %v448_v10  ;;  %1171 = vmatpush.bf16.msrb.mxu0 %v2175_v59 }
  0x4c   :  { %v312_v46 = vadd.f32 %v301_v32, %v277_v63  ;;  %v462_v5 = vadd.f32 %v456_v7, %v449_v44  ;;  %v463_v47 = vadd.f32 %v457_v27, %v450_v60  ;;  %v469_v49 = vmul.f32 %v1899_v37, %v2151_v26 }
  0x4d   :  { %v326_v18 = vrot.slane %v311_v33, 3  ;;  %v329_v48 = vrot.slane %v313_v41, 3  ;;  %v470_v24 = vmul.f32 %v1899_v37, %v2156_v17  ;;  %v474_v50 = vadd.f32 %v468_v23, %v461_v4 }
  0x4e   :  { %v327_v6 = vrot.slane %v312_v46, 3  ;;  %v481_v34 = vmul.f32 %v1902_v38, %v2109_v61  ;;  %v482_v52 = vmul.f32 %v1902_v38, %v2114_v16  ;;  %v475_v53 = vadd.f32 %v469_v49, %v462_v5 }
  0x4f   :  { %v476_v54 = vadd.f32 %v470_v24, %v463_v47  ;;  %v483_v37 = vmul.f32 %v1902_v38, %v2119_v21  ;;  %v516_v55 = vmul.f32 %v1911_v42, %v2013_v35  ;;  %v517_v62 = vmul.f32 %v1911_v42, %v2018_v40  ;;  %v2195_v38 = vld [vmem:[%s2496_s2 + $0x80] sm:$0xff] }
  0x50   :  { %v328_v25 = vsel %vm320_vm2, %v326_v18, %v327_v6  ;;  %v330_v19 = vsel %vm320_vm2, %v327_v6, %v329_v48  ;;  %v495_v31 = vrot.slane %v481_v34, 2  ;;  %v496_v58 = vrot.slane %v482_v52, 2  ;;  %1172 = vmatpush.bf16.msrb.mxu0 %v2195_v38 }
  0x51   :  { %v336_v45 = vpack.c.bf16 %v330_v19, %v328_v25  ;;  %v498_v22 = vrot.slane %v483_v37, 2  ;;  %v518_v63 = vmul.f32 %v1911_v42, %v2024_v43  ;;  %v530_v1 = vrot.slane %v516_v55, 2  ;;  %v1585_v25 = vld [vmem:[%s2500_s4 + $0x78] sm:$0xff] }
  0x52   :  { %v497_v0 = vsel %vm221_vm1, %v495_v31, %v496_v58  ;;  %v551_v3 = vmul.f32 %v1914_v8, %v2133_v2  ;;  %v552_v10 = vmul.f32 %v1914_v8, %v2151_v26  ;;  %v531_v20 = vrot.slane %v517_v62, 2  ;;  %v1569_v19 = vld [vmem:[%s2500_s4 + $0x38] sm:$0xff]  ;;  %867 = vmatpush.bf16.msra.mxu2 %v1585_v25 }
  0x53   :  { %416 = vmatmul.bf16.gmra.mxu0 %v336_v45  ;;  %v499_v44 = vsel %vm221_vm1, %v496_v58, %v498_v22  ;;  %v509_v42 = vadd.f32 %v497_v0, %v474_v50  ;;  %v511_v60 = vadd.f32 %v498_v22, %v476_v54  ;;  %v533_v7 = vrot.slane %v518_v63, 2  ;;  %934 = vmatpush.bf16.msra.mxu3 %v1569_v19  ;;  %v1584_v0 = vld [vmem:[%s2500_s4 + $0x70] sm:$0xff] }
  0x54   :  { %v510_v15 = vadd.f32 %v499_v44, %v475_v53  ;;  %v553_v27 = vmul.f32 %v1914_v8, %v2156_v17  ;;  %v565_v32 = vrot.slane %v551_v3, 2  ;;  %v532_v33 = vsel %vm221_vm1, %v530_v1, %v531_v20 }
  0x55   :  { %v566_v41 = vrot.slane %v552_v10, 2  ;;  %v586_v23 = vmul.f32 %v1962_v36, %v2109_v61  ;;  %v587_v46 = vmul.f32 %v1962_v36, %v2114_v16  ;;  %v534_v4 = vsel %vm221_vm1, %v531_v20, %v533_v7  ;;  %v2245_v10 = vld [vmem:[%s2497_s0 + $0x8] sm:$0xff] }
  0x56   :  { %v544_v5 = vadd.f32 %v532_v33, %v509_v42  ;;  %v546_v47 = vadd.f32 %v533_v7, %v511_v60  ;;  %v568_v18 = vrot.slane %v553_v27, 2  ;;  %v545_v48 = vadd.f32 %v534_v4, %v510_v15  ;;  %868 = vmatpush.bf16.msra.mxu2 %v1584_v0 }
  0x57   :  { %v567_v8 = vsel %vm221_vm1, %v565_v32, %v566_v41  ;;  %v588_v49 = vmul.f32 %v1962_v36, %v2119_v21  ;;  %v601_v24 = vrot.slane %v586_v23, 4  ;;  %v602_v34 = vrot.slane %v587_v46, 4  ;;  %v41_v46 = vld [vmem:[%s2497_s0 + $0x90] sm:$0xff] }
  0x58   :  { %v569_v6 = vsel %vm221_vm1, %v566_v41, %v568_v18  ;;  %v579_v61 = vadd.f32 %v567_v8, %v544_v5  ;;  %v581_v50 = vadd.f32 %v568_v18, %v546_v47  ;;  %v622_v53 = vmul.f32 %v1974_v51, %v2013_v35  ;;  %v1583_v47 = vld [vmem:[%s2500_s4 + $0x68] sm:$0xff]  ;;  %v25_v8 = vld [vmem:[%s2497_s0 + $0x10] sm:$0xff] }
  0x59   :  { %v580_v16 = vadd.f32 %v569_v6, %v545_v48  ;;  %v604_v52 = vrot.slane %v588_v49, 4  ;;  %v623_v54 = vmul.f32 %v1974_v51, %v2018_v40  ;;  %v603_v37 = vsel %vm595_vm3, %v601_v24, %v602_v34  ;;  %v2277_v49 = vld [vmem:[%s2497_s0 + $0x98] sm:$0xff] }
  0x5a   :  { %v624_v55 = vmul.f32 %v1974_v51, %v2024_v43  ;;  %v657_v36 = vmul.f32 %v1979_v56, %v2133_v2  ;;  %v658_v21 = vmul.f32 %v1979_v56, %v2151_v26  ;;  %v615_v58 = vadd.f32 %v603_v37, %v579_v61  ;;  %v23_v26 = vld [vmem:[%s2497_s0] sm:$0xff]  ;;  %v1567_v61 = vld [vmem:[%s2500_s4 + $0x28] sm:$0xff]  ;;  %869 = vmatpush.bf16.msra.mxu2 %v1583_v47 }
  0x5b   :  { %v605_v31 = vsel %vm595_vm3, %v602_v34, %v604_v52  ;;  %v617_v45 = vadd.f32 %v604_v52, %v581_v50  ;;  %v636_v22 = vrot.slane %v622_v53, 4  ;;  %v637_v62 = vrot.slane %v623_v54, 4 }
  0x5c   :  { %v616_v51 = vadd.f32 %v605_v31, %v580_v16  ;;  %v639_v63 = vrot.slane %v624_v55, 4  ;;  %v659_v2 = vmul.f32 %v1979_v56, %v2156_v17  ;;  %v671_v1 = vrot.slane %v657_v36, 4  ;;  %v1568_v17 = vld [vmem:[%s2500_s4 + $0x30] sm:$0xff]  ;;  %v1582_v31 = vld [vmem:[%s2500_s4 + $0x60] sm:$0xff] }
  0x5d   :  { %v672_v3 = vrot.slane %v658_v21, 4  ;;  %v2248_v44 = vperm.slane %v1957_v30, 2  ;;  %v2251_v56 = vperm.slane %v1957_v30, 3  ;;  %v638_v42 = vsel %vm595_vm3, %v636_v22, %v637_v62  ;;  %935 = vmatpush.bf16.msra.mxu3 %v1568_v17  ;;  %v68_v22 = vld [vmem:[%s2498_s1 + $0x18] sm:$0x7] }
  0x5e   :  { %v640_v60 = vsel %vm595_vm3, %v637_v62, %v639_v63  ;;  %v652_v20 = vadd.f32 %v639_v63, %v617_v45  ;;  %v674_v15 = vrot.slane %v659_v2, 4  ;;  %v650_v7 = vadd.f32 %v638_v42, %v615_v58  ;;  %v1566_v63 = vld [vmem:[%s2500_s4 + $0x20] sm:$0xff]  ;;  %870 = vmatpush.bf16.msra.mxu2 %v1582_v31 }
  0x5f   :  { %v651_v27 = vadd.f32 %v640_v60, %v616_v51  ;;  %v673_v32 = vsel %vm595_vm3, %v671_v1, %v672_v3  ;;  %v954_v33 = vmul.f32 %v2248_v44, %v23_v26  ;;  %v955_v4 = vmul.f32 %v2248_v44, %v2245_v10 }
  0x60   :  { %v675_v41 = vsel %vm595_vm3, %v672_v3, %v674_v15  ;;  %v687_v23 = vadd.f32 %v674_v15, %v652_v20  ;;  %v959_v5 = vmul.f32 %v2251_v56, %v1695_v9  ;;  %v685_v18 = vadd.f32 %v673_v32, %v650_v7  ;;  %v43_v3 = vld [vmem:[%s2497_s0 + $0xa0] sm:$0xff] }
  0x61   :  { %v686_v48 = vadd.f32 %v675_v41, %v651_v27  ;;  %v960_v24 = vmul.f32 %v2251_v56, %v1703_v11  ;;  %v2282_v6 = vperm.slane %v1957_v30, 4  ;;  %v2288_v16 = vperm.slane %v1957_v30, 5  ;;  %936 = vmatpush.bf16.msra.mxu3 %v1567_v61 }
  0x62   :  { %v702_v50 = vrot.slane %v687_v23, 2  ;;  %v963_v34 = vadd.f32 %v959_v5, %v954_v33  ;;  %v2291_v52 = vperm.slane %v1957_v30, 6  ;;  %v699_v53 = vrot.slane %v685_v18, 2 }
  0x63   :  { %v700_v54 = vrot.slane %v686_v48, 2  ;;  %v964_v37 = vadd.f32 %v960_v24, %v955_v4  ;;  %v968_v55 = vmul.f32 %v2282_v6, %v41_v46  ;;  %v969_v36 = vmul.f32 %v2282_v6, %v2277_v49 }
  0x64   :  { %v977_v21 = vmul.f32 %v2288_v16, %v23_v26  ;;  %v978_v25 = vmul.f32 %v2288_v16, %v2245_v10  ;;  %v979_v19 = vmul.f32 %v2288_v16, %v25_v8  ;;  %v1008_v62 = vmul.f32 %v2291_v52, %v1695_v9 }
  0x65   :  { %v701_v58 = vsel %vm221_vm1, %v699_v53, %v700_v54  ;;  %v703_v45 = vsel %vm221_vm1, %v700_v54, %v702_v50  ;;  %v972_v51 = vadd.f32 %v968_v55, %v963_v34  ;;  %v973_v26 = vadd.f32 %v969_v36, %v964_v37  ;;  %937 = vmatpush.bf16.msra.mxu3 %v1566_v63  ;;  %v1622_v36 = vld [vmem:[%s2497_s0 + $0x50] sm:$0xff] }
  0x66   :  { %v709_v2 = vpack.c.bf16 %v703_v45, %v701_v58  ;;  %v989_v0 = vrot.slane %v977_v21, 4  ;;  %v990_v1 = vrot.slane %v978_v25, 4  ;;  %v992_v17 = vrot.slane %v979_v19, 4 }
  0x67   :  { %v1009_v42 = vmul.f32 %v2291_v52, %v1703_v11  ;;  %v1010_v9 = vmul.f32 %v2291_v52, %v1708_v12  ;;  %v1020_v60 = vrot.slane %v1008_v62, 4  ;;  %v2322_v15 = vperm.slane %v1957_v30, 7 }
  0x68   :  { %790 = vmatmul.bf16.gmra.mxu1 %v709_v2  ;;  %v991_v20 = vsel %vm595_vm3, %v989_v0, %v990_v1  ;;  %v2324_v7 = vperm.slane %v68_v22, 0  ;;  %v993_v27 = vsel %vm595_vm3, %v990_v1, %v992_v17  ;;  %v2333_v47 = vperm.slane %v68_v22, 1  ;;  %v1565_v0 = vld [vmem:[%s2500_s4 + $0x18] sm:$0xff]  ;;  %v1564_v1 = vld [vmem:[%s2500_s4 + $0x10] sm:$0xff]  ;;  %v1618_v17 = vld [vmem:[%s2499_s3] ss:$0 sm:$0xff] }
  0x69   :  { %v1003_v32 = vadd.f32 %v991_v20, %v972_v51  ;;  %v1021_v33 = vrot.slane %v1009_v42, 4  ;;  %v1023_v41 = vrot.slane %v1010_v9, 4  ;;  %v1004_v11 = vadd.f32 %v993_v27, %v973_v26  ;;  %v1581_v26 = vld [vmem:[%s2500_s4 + $0x58] sm:$0xff]  ;;  %938 = vmatpush.bf16.msra.mxu3 %v1565_v0  ;;  %v1579_v42 = vld [vmem:[%s2500_s4 + $0x48] sm:$0xff]  ;;  %v1578_v20 = vld [vmem:[%s2500_s4 + $0x40] sm:$0xff] }
  0x6a   :  { %v1039_v23 = vmul.f32 %v2322_v15, %v41_v46  ;;  %v1040_v12 = vmul.f32 %v2322_v15, %v2277_v49  ;;  %v1041_v4 = vmul.f32 %v2322_v15, %v43_v3  ;;  %v1070_v34 = vmul.f32 %v2324_v7, %v2245_v10  ;;  %v1623_v10 = vld [vmem:[%s2497_s0 + $0x58] sm:$0xff]  ;;  %871 = vmatpush.bf16.msra.mxu2 %v1581_v26  ;;  %v1563_v9 = vld [vmem:[%s2500_s4 + $0x8] sm:$0xff]  ;;  %v1562_v27 = vld [vmem:[%s2500_s4] sm:$0xff] }
  0x6b   :  { %v1022_v30 = vsel %vm595_vm3, %v1020_v60, %v1021_v33  ;;  %v1024_v5 = vsel %vm595_vm3, %v1021_v33, %v1023_v41  ;;  %v2337_v46 = vperm.slane %v68_v22, 2  ;;  %v1071_v54 = vmul.f32 %v2324_v7, %v25_v8 }
  0x6c   :  { %v1034_v18 = vadd.f32 %v1022_v30, %v1003_v32  ;;  %v1035_v48 = vadd.f32 %v1024_v5, %v1004_v11  ;;  %v1051_v24 = vrot.slane %v1039_v23, 4  ;;  %v1052_v61 = vrot.slane %v1040_v12, 4 }
  0x6d   :  { %v1054_v50 = vrot.slane %v1041_v4, 4  ;;  %v1079_v21 = vmul.f32 %v1622_v36, %v2333_v47  ;;  %v1080_v19 = vmul.f32 %v1623_v10, %v2333_v47  ;;  %v1088_v8 = vmul.f32 %v2337_v46, %v2277_v49  ;;  %v1580_v49 = vld [vmem:[%s2500_s4 + $0x50] sm:$0xff]  ;;  %939 = vmatpush.bf16.msra.mxu3 %v1564_v1  ;;  %v2388_v4 = vld [vmem:[%s2499_s3 + $0x1] ss:$0 sm:$0xff] }
  0x6e   :  { %v1053_v53 = vsel %vm595_vm3, %v1051_v24, %v1052_v61  ;;  %v1089_v45 = vmul.f32 %v2337_v46, %v43_v3  ;;  %872 = vmatpush.bf16.msra.mxu2 %v1580_v49  ;;  %v1594_v1 = vld [vmem:[%s2500_s4 + $0x80] sm:$0xff] }
  0x6f   :  { %v1055_v37 = vsel %vm595_vm3, %v1052_v61, %v1054_v50  ;;  %v1065_v55 = vadd.f32 %v1053_v53, %v1034_v18  ;;  %v1599_v18 = vld [vmem:[%s2500_s4 + $0xa8] sm:$0xff] }
  0x70   :  { %v1066_v25 = vadd.f32 %v1055_v37, %v1035_v48  ;;  %v1598_v48 = vld [vmem:[%s2500_s4 + $0xa0] sm:$0xff]  ;;  %v44_v61 = vld [vmem:[%s2497_s0 + $0xa8] sm:$0xff]  ;;  %v1596_v37 = vld [vmem:[%s2500_s4 + $0x90] sm:$0xff] }
  0x71   :  { %v1074_v31 = vadd.f32 %v1070_v34, %v1065_v55  ;;  %940 = vmatpush.bf16.msra.mxu3 %v1563_v9  ;;  %v45_v34 = vld [vmem:[%s2497_s0 + $0xb0] sm:$0xff]  ;;  %v46_v55 = vld [vmem:[%s2497_s0 + $0xb8] sm:$0xff]  ;;  %v956_v36 = vmul.f32 %v2248_v44, %v44_v61 }
  0x72   :  { %v1075_v58 = vadd.f32 %v1071_v54, %v1066_v25  ;;  %873 = vmatpush.bf16.msra.mxu2 %v1579_v42  ;;  %v957_v10 = vmul.f32 %v2248_v44, %v45_v34 }
  0x73   :  { %v1083_v22 = vadd.f32 %v1079_v21, %v1074_v31  ;;  %v961_v21 = vmul.f32 %v2251_v56, %v2013_v35  ;;  %v62_v31 = vld [vmem:[%s2497_s0 + $0x138] sm:$0xff] }
  0x74   :  { %v1084_v51 = vadd.f32 %v1080_v19, %v1075_v58  ;;  %v962_v19 = vmul.f32 %v2251_v56, %v2018_v40  ;;  %v980_v58 = vmul.f32 %v2288_v16, %v44_v61  ;;  %v1595_v56 = vld [vmem:[%s2500_s4 + $0x88] sm:$0xff] }
  0x75   :  { %v1092_v62 = vadd.f32 %v1088_v8, %v1083_v22  ;;  %941 = vmatpush.bf16.msra.mxu3 %v1562_v27  ;;  %v2434_v8 = vld [vmem:[%s2497_s0 + $0x140] sm:$0xff]  ;;  %v982_v22 = vmul.f32 %v2288_v16, %v46_v55  ;;  %v1042_v27 = vmul.f32 %v2322_v15, %v62_v31 }
  0x76   :  { %v1093_v63 = vadd.f32 %v1089_v45, %v1084_v51  ;;  %874 = vmatpush.bf16.msra.mxu2 %v1578_v20  ;;  %v981_v45 = vmul.f32 %v2288_v16, %v45_v34  ;;  %v965_v51 = vadd.f32 %v961_v21, %v956_v36  ;;  %v994_v26 = vrot.slane %v980_v58, 4 }
  0x77   :  { %v997_v49 = vrot.slane %v982_v22, 4  ;;  %v1011_v16 = vmul.f32 %v2291_v52, %v2013_v35 }
  0x78   :  { %v1096_v2 = vpack.c.bf16 %v1093_v63, %v1092_v62  ;;  %v966_v62 = vadd.f32 %v962_v19, %v957_v10  ;;  %v970_v63 = vmul.f32 %v2282_v6, %v62_v31  ;;  %v995_v0 = vrot.slane %v981_v45, 4 }
  0x79   :  { %v1025_v20 = vrot.slane %v1011_v16, 4  ;;  %v1082_v10 = vmul.f32 %v2333_v47, %v2024_v43 }
  0x7a   :  { %1173 = vmatmul.bf16.vlgmr.msrb.gmra.mxu0 %v1096_v2  ;;  %1602 = vmatpush.bf16.msrb.mxu2 %v1881_v28  ;;  %v971_v2 = vmul.f32 %v2282_v6, %v2434_v8  ;;  %v64_v6 = vld [vmem:[%s2497_s0 + $0x148] sm:$0xff]  ;;  %v974_v42 = vadd.f32 %v970_v63, %v965_v51  ;;  %v996_v35 = vsel %vm595_vm3, %v994_v26, %v995_v0 }
  0x7b   :  { %v1091_v31 = vmul.f32 %v2337_v46, %v64_v6 }
  0x7c   :  { %v975_v9 = vadd.f32 %v971_v2, %v966_v62 }
  0x7e   :  { %1603 = vmatpush.bf16.msrb.mxu2 %v1908_v39  ;;  %v1601_v39 = vld [vmem:[%s2500_s4 + $0xb8] sm:$0xff] }
  0x7f   :  { %1255 = vmatpush.bf16.msrb.mxu1 %v1601_v39  ;;  %1610 = vmatpush.bf16.msrb.mxu3 %v1601_v39 }
  0x82   :  { %1604 = vmatpush.bf16.msrb.mxu2 %v1934_v57 }
  0x86   :  { %1605 = vmatpush.bf16.msrb.mxu2 %v1952_v29 }
  0x8a   :  { %1606 = vmatpush.bf16.msrb.mxu2 %v2128_v14 }
  0x8e   :  { %1607 = vmatpush.bf16.msrb.mxu2 %v2145_v13  ;;  %v1600_v13 = vld [vmem:[%s2500_s4 + $0xb0] sm:$0xff] }
  0x8f   :  { %1256 = vmatpush.bf16.msrb.mxu1 %v1600_v13  ;;  %1611 = vmatpush.bf16.msrb.mxu3 %v1600_v13 }
  0x92   :  { %1608 = vmatpush.bf16.msrb.mxu2 %v2175_v59 }
  0x93   :  { %1257 = vmatpush.bf16.msrb.mxu1 %v1599_v18  ;;  %1612 = vmatpush.bf16.msrb.mxu3 %v1599_v18 }
  0x96   :  { %1609 = vmatpush.bf16.msrb.mxu2 %v2195_v38  ;;  %v1597_v38 = vld [vmem:[%s2500_s4 + $0x98] sm:$0xff] }
  0x97   :  { %1258 = vmatpush.bf16.msrb.mxu1 %v1598_v48  ;;  %1613 = vmatpush.bf16.msrb.mxu3 %v1598_v48 }
  0x9b   :  { %1259 = vmatpush.bf16.msrb.mxu1 %v1597_v38  ;;  %1614 = vmatpush.bf16.msrb.mxu3 %v1597_v38  ;;  %v1073_v38 = vmul.f32 %v2324_v7, %v46_v55  ;;  %v1090_v55 = vmul.f32 %v2337_v46, %v2434_v8  ;;  %v1621_v46 = vld [vmem:[%s2501_s5] ss:$0 sm:$0xff] }
  0x9f   :  { %1260 = vmatpush.bf16.msrb.mxu1 %v1596_v37  ;;  %1615 = vmatpush.bf16.msrb.mxu3 %v1596_v37 }
  0xa2   :  { %v412_v3 = vpop.f32.mrf.mxu0 }
  0xa3   :  { %v413_v60 = vadd.f32 %v1618_v17, %v412_v3  ;;  %1261 = vmatpush.bf16.msrb.mxu1 %v1595_v56  ;;  %1616 = vmatpush.bf16.msrb.mxu3 %v1595_v56  ;;  %v1012_v3 = vmul.f32 %v2291_v52, %v2018_v40 }
  0xa5   :  { %v422_v33 = vmax.f32 %v413_v60, 0.0  ;;  %v998_v60 = vsel %vm595_vm3, %v995_v0, %v997_v49 }
  0xa7   :  { %1262 = vmatpush.bf16.msrb.mxu1 %v1594_v1  ;;  %1617 = vmatpush.bf16.msrb.mxu3 %v1594_v1 }
  0xaa   :  { %v414_v32 = vpop.f32.mrf.mxu0 }
  0xab   :  { %v415_v41 = vadd.f32 %v1618_v17, %v414_v32 }
  0xad   :  { %v423_v11 = vmax.f32 %v415_v41, 0.0 }
  0xaf   :  { %v426_v23 = vpack.c.bf16 %v423_v11, %v422_v33  ;;  %v1026_v33 = vrot.slane %v1012_v3, 4  ;;  %v1044_v11 = vmul.f32 %v2322_v15, %v64_v6 }
  0xb1   :  { %942 = vmatmul.bf16.vlgmr.msra.gmra.mxu3 %v426_v23  ;;  %v1005_v23 = vadd.f32 %v996_v35, %v974_v42 }
  0xbb   :  { %v786_v12 = vpop.f32.mrf.mxu1 }
  0xbc   :  { %v787_v28 = vadd.f32 %v2388_v4, %v786_v12  ;;  %v1006_v12 = vadd.f32 %v998_v60, %v975_v9 }
  0xbe   :  { %v796_v57 = vmax.f32 %v787_v28, 0.0  ;;  %v1056_v28 = vrot.slane %v1042_v27, 4 }
  0xc3   :  { %v788_v30 = vpop.f32.mrf.mxu1 }
  0xc4   :  { %v789_v5 = vadd.f32 %v2388_v4, %v788_v30  ;;  %v1027_v30 = vsel %vm595_vm3, %v1025_v20, %v1026_v33 }
  0xc6   :  { %v797_v29 = vmax.f32 %v789_v5, 0.0 }
  0xc8   :  { %v800_v14 = vpack.c.bf16 %v797_v29, %v796_v57  ;;  %v1059_v57 = vrot.slane %v1044_v11, 4 }
  0xca   :  { %875 = vmatmul.bf16.vlgmr.msra.gmra.mxu2 %v800_v14  ;;  %v1036_v14 = vadd.f32 %v1027_v30, %v1005_v23 }
  0xd0   :  { %v417_v59 = vpop.f32.mrf.mxu0 }
  0xd1   :  { %v418_v24 = vadd.f32 %v1618_v17, %v417_v59 }
  0xd3   :  { %v424_v53 = vmax.f32 %v418_v24, 0.0  ;;  %v1072_v24 = vmul.f32 %v2324_v7, %v45_v34 }
  0xd8   :  { %v419_v50 = vpop.f32.mrf.mxu0 }
  0xd9   :  { %v420_v54 = vadd.f32 %v1618_v17, %v419_v50  ;;  %v1013_v17 = vmul.f32 %v2291_v52, %v2024_v43  ;;  %v1043_v52 = vmul.f32 %v2322_v15, %v2434_v8 }
  0xdb   :  { %v425_v25 = vmax.f32 %v420_v54, 0.0  ;;  %v1028_v41 = vrot.slane %v1013_v17, 4  ;;  %v1057_v39 = vrot.slane %v1043_v52, 4 }
  0xdd   :  { %v427_v44 = vpack.c.bf16 %v425_v25, %v424_v53  ;;  %v1029_v5 = vsel %vm595_vm3, %v1026_v33, %v1028_v41  ;;  %v1058_v59 = vsel %vm595_vm3, %v1056_v28, %v1057_v39  ;;  %v1060_v48 = vsel %vm595_vm3, %v1057_v39, %v1059_v57 }
  0xde   :  { %v1037_v13 = vadd.f32 %v1029_v5, %v1006_v12  ;;  %v1067_v53 = vadd.f32 %v1058_v59, %v1036_v14  ;;  %v1081_v25 = vmul.f32 %v2333_v47, %v2018_v40 }
  0xdf   :  { %947 = vmatmul.bf16.gmra.mxu3 %v427_v44 }
  0xe0   :  { %v1068_v54 = vadd.f32 %v1060_v48, %v1037_v13  ;;  %v1076_v36 = vadd.f32 %v1072_v24, %v1067_v53 }
  0xe2   :  { %v1077_v21 = vadd.f32 %v1073_v38, %v1068_v54  ;;  %v1085_v7 = vadd.f32 %v1081_v25, %v1076_v36 }
  0xe4   :  { %v1086_v34 = vadd.f32 %v1082_v10, %v1077_v21  ;;  %v1094_v45 = vadd.f32 %v1090_v55, %v1085_v7 }
  0xe5   :  { %v791_v32 = vpop.f32.mrf.mxu1 }
  0xe6   :  { %v792_v29 = vadd.f32 %v2388_v4, %v791_v32  ;;  %v1095_v22 = vadd.f32 %v1091_v31, %v1086_v34 }
  0xe8   :  { %v798_v61 = vmax.f32 %v792_v29, 0.0  ;;  %v1097_v51 = vpack.c.bf16 %v1095_v22, %v1094_v45 }
  0xed   :  { %v793_v18 = vpop.f32.mrf.mxu1 }
  0xee   :  { %v794_v15 = vadd.f32 %v2388_v4, %v793_v18  ;;  %v1620_v4 = vld [vmem:[%s2499_s3 + $0x2] ss:$0 sm:$0xff] }
  0xf0   :  { %v799_v50 = vmax.f32 %v794_v15, 0.0 }
  0xf2   :  { %v801_v37 = vpack.c.bf16 %v799_v50, %v798_v61 }
  0xf4   :  { %880 = vmatmul.bf16.gmra.mxu2 %v801_v37 }
  0xf7   :  { %v1174_v19 = vpop.f32.mrf.mxu0 }
  0xf8   :  { %v1175_v58 = vadd.f32 %v1620_v4, %v1174_v19 }
  0xfa   :  { %v1184_v40 = vmax.f32 %v1175_v58, 0.0 }
  0xff   :  { %v1176_v44 = vpop.f32.mrf.mxu0 }
 0x100   :  { %v1177_v56 = vadd.f32 %v1620_v4, %v1176_v44 }
 0x102   :  { %v1185_v43 = vmax.f32 %v1177_v56, 0.0 }
 0x104   :  { %v1188_v47 = vpack.c.bf16 %v1185_v43, %v1184_v40  ;;  %1178 = vmatmul.bf16.vlgmr.msrb.gmra.mxu2 %v1097_v51 }
 0x106   :  { %1263 = vmatmul.bf16.vlgmr.msrb.gmra.mxu1 %v1188_v47 }
 0x134   :  { %v943_v26 = vpop.f32.mrf.mxu3 }
 0x13c   :  { %v945_v3 = vpop.f32.mrf.mxu3 }
 0x14d   :  { %v876_v62 = vpop.f32.mrf.mxu2 }
 0x14e   :  { %v944_v49 = vadd.f32 %v943_v26, %v876_v62 }
 0x155   :  { %v878_v63 = vpop.f32.mrf.mxu2 }
 0x156   :  { %v946_v42 = vadd.f32 %v945_v3, %v878_v63 }
 0x162   :  { %v948_v23 = vpop.f32.mrf.mxu3 }
 0x16a   :  { %v950_v12 = vpop.f32.mrf.mxu3 }
 0x177   :  { %v881_v2 = vpop.f32.mrf.mxu2 }
 0x178   :  { %v949_v28 = vadd.f32 %v948_v23, %v881_v2 }
 0x17f   :  { %v883_v0 = vpop.f32.mrf.mxu2 }
 0x180   :  { %v951_v29 = vadd.f32 %v950_v12, %v883_v0 }
 0x183   :  { %v1264_v8 = vpop.f32.mrf.mxu1 }
 0x184   :  { %v1274_v16 = vadd.f32 %v1264_v8, %v944_v49 }
 0x186   :  { %v1282_v1 = vadd.f32 %v1621_v46, %v1274_v16 }
 0x187   :  { %v1179_v17 = vpop.f32.mrf.mxu2 }
 0x188   :  { %v1286_v6 = vmax.f32 %v1282_v1, 0.0  ;;  %v1180_v60 = vadd.f32 %v1620_v4, %v1179_v17 }
 0x18a   :  { %1290 = vst [vmem:[%s2502_s6] sm:$0xff] %v1286_v6  ;;  %v1186_v41 = vmax.f32 %v1180_v60, 0.0 }
 0x18b   :  { %v1266_v9 = vpop.f32.mrf.mxu1 }
 0x18c   :  { %v1275_v35 = vadd.f32 %v1266_v9, %v946_v42 }
 0x18e   :  { %v1283_v20 = vadd.f32 %v1621_v46, %v1275_v35 }
 0x18f   :  { %v1181_v27 = vpop.f32.mrf.mxu2 }
 0x190   :  { %v1287_v32 = vmax.f32 %v1283_v20, 0.0  ;;  %v1182_v33 = vadd.f32 %v1620_v4, %v1181_v27 }
 0x192   :  { %1291 = vst [vmem:[%s2502_s6 + $0x8] sm:$0xff] %v1287_v32  ;;  %v1187_v52 = vmax.f32 %v1182_v33, 0.0 }
 0x194   :  { %v1189_v11 = vpack.c.bf16 %v1187_v52, %v1186_v41 }
 0x196   :  { %1268 = vmatmul.bf16.vlgmr.msrb.gmra.mxu3 %v1189_v11 }
 0x219   :  { %v1269_v30 = vpop.f32.mrf.mxu3 }
 0x21a   :  { %v1276_v5 = vadd.f32 %v1269_v30, %v949_v28 }
 0x21c   :  { %v1284_v39 = vadd.f32 %v1621_v46, %v1276_v5 }
 0x21e   :  { %v1288_v57 = vmax.f32 %v1284_v39, 0.0 }
 0x220   :  { %1292 = vst [vmem:[%s2502_s6 + $0x10] sm:$0xff] %v1288_v57 }
 0x221   :  { %v1271_v14 = vpop.f32.mrf.mxu3 }
 0x222   :  { %v1277_v13 = vadd.f32 %v1271_v14, %v951_v29 }
 0x224   :  { %v1285_v18 = vadd.f32 %v1621_v46, %v1277_v13 }
 0x226   :  { %v1289_v59 = vmax.f32 %v1285_v18, 0.0 }
 0x228   :  { %1293 = vst [vmem:[%s2502_s6 + $0x18] sm:$0xff] %v1289_v59 }

</bundles_post_ra>
